<compile_context>
chip_gen: v5e
topology: v5e:2x2
jax: 0.10.0
libtpu: 0.0.40
codegen_flags: <defaults>
</compile_context>

<pallas_src>
import jax
import jax.numpy as jnp
from jax.experimental import pallas as pl
from jax.experimental.pallas import tpu as pltpu

_KPAD = 128   # lane-dense padding for the per-class outputs / conv weights
_TAPS = 9     # 3x3 conv taps


# ----------------------------------------------------------------------------
# Fused kernel: conv3x3 (pool-commuted) + masking + AdaptiveAvgPool2d(1)
# One batch element per grid step; emits a lane-dense (1, _KPAD) pooled row.
# ----------------------------------------------------------------------------
def _make_pooled_kernel(*, H, W, Cin, apply_mask):
    inv_hw = 1.0 / float(H * W)

    def compute(w_ref, b_ref, x_ref, out_ref, m_plane, c_ref):
        # ---- weighted road mask (runtime non-road weight, no retrace) ------
        if apply_mask:
            m = m_plane.astype(jnp.float32)                      # (H, W)
            c = c_ref[0]                                         # non-road weight
            wm = m + (1.0 - m) * c                               # == m when c == 0
            mask_mean = jnp.sum(wm, keepdims=True) * inv_hw      # (1, 1)
            # Zero-pad the weighted mask ONCE; the 9 shifted-mask planes are
            # static slices of this one padded plane, shared across all Cin.
            zrow = jnp.zeros((1, W), jnp.float32)
            zcol = jnp.zeros((H + 2, 1), jnp.float32)
            wmp = jnp.concatenate([zrow, wm, zrow], axis=0)      # (H+2, W)
            wmp = jnp.concatenate([zcol, wmp, zcol], axis=1)     # (H+2, W+2)
        else:
            mask_mean = 1.0
            rows = jax.lax.broadcasted_iota(jnp.int32, (H, W), 0)
            cols = jax.lax.broadcasted_iota(jnp.int32, (H, W), 1)

        # channel planes: load + upcast once, reused for all 9 taps
        xcs = [x_ref[0, ci, :, :].astype(jnp.float32) for ci in range(Cin)]

        w_all = w_ref[...]                                       # (9*Cin, _KPAD)
        pooled = b_ref[...] * mask_mean                          # (1, _KPAD)

        # pooled[co] = sum_{tap,ci} w[tap,ci,co] * S[tap,ci] + b[co]*mean(mask)
        #   with S[tap,ci] = mean_ij( shifted_mask[tap] * x[ci] )
        for kh in range(3):
            dh = kh - 1
            if not apply_mask:
                row_ok = (rows >= dh) & (rows < H + dh)
            for kw in range(3):
                dw = kw - 1
                if apply_mask:
                    # sm[i,j] = wm[i-dh, j-dw], zero where out of range
                    sm = wmp[1 - dh:1 - dh + H, 1 - dw:1 - dw + W]    # (H, W)
                else:
                    sm = (row_ok & (cols >= dw) & (cols < W + dw)
                          ).astype(jnp.float32)
                for ci in range(Cin):
                    s = jnp.sum(sm * xcs[ci], keepdims=True) * inv_hw  # (1, 1)
                    row = (kh * 3 + kw) * Cin + ci
                    pooled = pooled + s * w_all[row:row + 1, :]
        out_ref[0] = pooled

    if apply_mask:
        def kernel(c_ref, w_ref, b_ref, x_ref, m_ref, out_ref):
            compute(w_ref, b_ref, x_ref, out_ref, m_ref[0, 0, :, :], c_ref)
    else:
        def kernel(w_ref, b_ref, x_ref, out_ref):
            compute(w_ref, b_ref, x_ref, out_ref, None, None)
    return kernel


# ----------------------------------------------------------------------------
# Wrapper around pallas_call: returns pooled features (B, num_classes)
# ----------------------------------------------------------------------------
def _pooled_features(params, x_nchw, mask_nchw, *, mask_weight, apply_mask,
                     compute_dtype=jnp.bfloat16):
    B, Cin, H, W = x_nchw.shape
    K = params["conv_w"].shape[-1]
    assert K <= _KPAD, "num_classes must fit in one 128-lane vreg row"

    x = x_nchw.astype(compute_dtype)                # bf16 DMA, f32 accumulation
    in_itemsize = jnp.dtype(compute_dtype).itemsize

    # 3x3 HWIO conv weights flattened to (9*Cin, K) rows ordered (kh, kw, ci),
    # zero-padded to 128 lanes (lane-dense, unmasked output stores).
    wflat = params["conv_w"].astype(jnp.float32).reshape(_TAPS * Cin, K)
    wmat = jnp.zeros((_TAPS * Cin, _KPAD), jnp.float32).at[:, :K].set(wflat)
    bvec = jnp.zeros((1, _KPAD), jnp.float32).at[0, :K].set(
        params["conv_b"].astype(jnp.float32))

    kernel = _make_pooled_kernel(H=H, W=W, Cin=Cin, apply_mask=bool(apply_mask))

    in_specs = []
    args = []
    mask_bytes = 0
    if apply_mask:
        # Runtime scalar so changing mask_weight never retraces. The module's
        # mask_weight==1.0 branch ("full masking") is the weighted formula
        # with non-road weight 0.
        c_eff = 0.0 if float(mask_weight) == 1.0 else float(mask_weight)
        in_specs.append(pl.BlockSpec(memory_space=pltpu.MemorySpace.SMEM))
        args.append(jnp.asarray([c_eff], jnp.float32))
    in_specs += [
        pl.BlockSpec((_TAPS * Cin, _KPAD), lambda b: (0, 0)),     # conv weights
        pl.BlockSpec((1, _KPAD), lambda b: (0, 0)),               # conv bias
        pl.BlockSpec((1, Cin, H, W), lambda b: (b, 0, 0, 0)),     # image (bf16)
    ]
    args += [wmat, bvec, x]
    if apply_mask:
        m = mask_nchw.astype(compute_dtype)
        in_specs.append(pl.BlockSpec((1, 1, H, W), lambda b: (b, 0, 0, 0)))
        args.append(m)
        mask_bytes = m.size * in_itemsize

    # VMEM budget: double-buffered bf16 input blocks + in-kernel f32 planes
    # (upcast channels, weighted/padded mask, shifted-mask, product) + weights.
    per_step = (2 * (Cin + (1 if apply_mask else 0)) * H * W * in_itemsize
                + (Cin + 4) * H * W * 4
                + (_TAPS * Cin + 3) * _KPAD * 4)
    vmem_cap = 64 * 2**20                      # conservative (v7x physical)
    try:
        vmem_cap = int(pltpu.get_tpu_info().vmem_capacity_bytes)
    except Exception:
        pass                                   # keep conservative default
    vmem_limit = int(min(int(0.75 * vmem_cap), max(32 * 2**20, 3 * per_step)))

    flops = B * (2 * _TAPS * Cin * H * W       # 36 mul+reduce per image
                 + 8 * H * W                   # mask weighting / padding
                 + 2 * _TAPS * Cin * _KPAD)    # pooled FMAs
    bytes_accessed = (x.size * in_itemsize + mask_bytes
                      + wmat.size * 4 + bvec.size * 4 + B * _KPAD * 4)

    out = pl.pallas_call(
        kernel,
        out_shape=jax.ShapeDtypeStruct((B, 1, _KPAD), jnp.float32),
        grid=(B,),
        in_specs=in_specs,
        out_specs=pl.BlockSpec((1, 1, _KPAD), lambda b: (b, 0, 0)),
        compiler_params=pltpu.CompilerParams(
            dimension_semantics=("parallel",),         # megacore over batch
            vmem_limit_bytes=vmem_limit),
        cost_estimate=pl.CostEstimate(flops=int(flops), transcendentals=0,
                                      bytes_accessed=int(bytes_accessed)),
    )(*args)
    return out[:, 0, :K]                                          # (B, K)


# ----------------------------------------------------------------------------
# Parameter init (mirrors _initialize_weights: kaiming_normal fan_out / relu on
# the Linear weights, zero biases; deterministic conv stand-in weights)
# ----------------------------------------------------------------------------
def init_params(key, in_ch=4, num_classes=3, hidden=128):
    k1, k2, k3 = jax.random.split(key, 3)
    return {
        # backbone stand-in (segmentation-head-style 3x3 conv), HWIO layout
        "conv_w": jax.random.normal(k1, (3, 3, in_ch, num_classes), jnp.float32) * 0.1,
        "conv_b": jnp.zeros((num_classes,), jnp.float32),
        # nn.Linear(num_classes, 128): kaiming fan_out -> std = sqrt(2/128)
        "w1": jax.random.normal(k2, (num_classes, hidden), jnp.float32)
              * jnp.sqrt(2.0 / hidden),
        "b1": jnp.zeros((1, hidden), jnp.float32),
        # nn.Linear(128, num_classes): fan_out -> std = sqrt(2/num_classes)
        "w2": jax.random.normal(k3, (hidden, num_classes), jnp.float32)
              * jnp.sqrt(2.0 / num_classes),
        "b2": jnp.zeros((1, num_classes), jnp.float32),
    }


# ----------------------------------------------------------------------------
# Forward pass (matches HybridRoadDistressModel.forward semantics)
# ----------------------------------------------------------------------------
def hybrid_forward(params, x_nchw, mask_nchw=None, *, use_masks=True,
                   mask_weight=1.0, compute_dtype=jnp.bfloat16):
    apply_mask = bool(use_masks) and (mask_nchw is not None)
    # TODO(synk): F.interpolate mask-resize branch is a no-op here because the
    #             stand-in backbone preserves the input spatial size.
    pooled = _pooled_features(params, x_nchw,
                              mask_nchw if apply_mask else None,
                              mask_weight=mask_weight, apply_mask=apply_mask,
                              compute_dtype=compute_dtype)
    # Classifier head as one batched XLA epilogue (a per-grid-step
    # (1,128)x(128,K) MXU matmul wastes the MXU and pays FIFO fill/drain).
    h = jnp.maximum(jnp.dot(pooled, params["w1"],
                            preferred_element_type=jnp.float32) + params["b1"], 0.0)
    # TODO(synk): nn.Dropout is identity at inference; training dropout omitted.
    return jnp.dot(h, params["w2"],
                   preferred_element_type=jnp.float32) + params["b2"]


# ----------------------------------------------------------------------------
# Pure-JAX reference (same stand-in math, same bf16 input quantization) for
# correctness checking with f32 accumulation on both paths.
# ----------------------------------------------------------------------------
def _reference_forward(params, x_nchw, mask_nchw, *, use_masks, mask_weight,
                       compute_dtype=jnp.bfloat16):
    hi = jax.lax.Precision.HIGHEST
    x = x_nchw.astype(compute_dtype).astype(jnp.float32)
    feat = jax.lax.conv_general_dilated(
        x, params["conv_w"], window_strides=(1, 1), padding="SAME",
        dimension_numbers=("NCHW", "HWIO", "NCHW"), precision=hi)
    feat = feat + params["conv_b"].reshape(1, -1, 1, 1)
    if use_masks and mask_nchw is not None:
        m = mask_nchw.astype(compute_dtype).astype(jnp.float32)
        if mask_weight != 1.0:
            m = m + (1.0 - m) * mask_weight
        feat = feat * m
    pooled = jnp.mean(feat, axis=(2, 3))                                  # (B, K)
    h = jnp.maximum(jnp.dot(pooled, params["w1"], precision=hi) + params["b1"], 0.0)
    return jnp.dot(h, params["w2"], precision=hi) + params["b2"]          # (B, K)


if __name__ == "__main__":
    key = jax.random.PRNGKey(0)
    kx, km, kp = jax.random.split(key, 3)

    B, C, H, W = 2, 4, 16, 16
    num_classes = 3

    x = jax.random.normal(kx, (B, C, H, W), jnp.float32)                # images
    mask = (jax.random.uniform(km, (B, 1, H, W)) > 0.3).astype(jnp.float32)  # road mask

    params = init_params(kp, in_ch=C, num_classes=num_classes, hidden=128)

    # Model-D-style config: weighted masks (mask_weight=0.5)
    logits = hybrid_forward(params, x, mask, use_masks=True, mask_weight=0.5)
    logits = jax.block_until_ready(logits)
    ref = _reference_forward(params, x, mask, use_masks=True, mask_weight=0.5)
    assert logits.shape == (B, num_classes)
    assert bool(jnp.all(jnp.isfinite(logits)))
    assert bool(jnp.allclose(logits, ref, atol=2e-3, rtol=2e-3))

    # Model-A/C-style config: full masks (mask_weight=1.0 branch)
    logits_fm = hybrid_forward(params, x, mask, use_masks=True, mask_weight=1.0)
    logits_fm = jax.block_until_ready(logits_fm)
    ref_fm = _reference_forward(params, x, mask, use_masks=True, mask_weight=1.0)
    assert logits_fm.shape == (B, num_classes)
    assert bool(jnp.all(jnp.isfinite(logits_fm)))
    assert bool(jnp.allclose(logits_fm, ref_fm, atol=2e-3, rtol=2e-3))

    # Model-B-style config: no masks (specialized kernel, no mask DMA at all)
    logits_nm = hybrid_forward(params, x, None, use_masks=False)
    logits_nm = jax.block_until_ready(logits_nm)
    ref_nm = _reference_forward(params, x, None, use_masks=False, mask_weight=1.0)
    assert logits_nm.shape == (B, num_classes)
    assert bool(jnp.all(jnp.isfinite(logits_nm)))
    assert bool(jnp.allclose(logits_nm, ref_nm, atol=2e-3, rtol=2e-3))

    print("KERNEL_OK")
</pallas_src>

<mosaic_0001>
module attributes {stable_mosaic.version = 11 : i64} {
  func.func @kernel(%arg0: i32, %arg1: memref<1xf32, #tpu.memory_space<smem>>, %arg2: memref<36x128xf32, #tpu.memory_space<vmem>>, %arg3: memref<1x128xf32, #tpu.memory_space<vmem>>, %arg4: memref<1x4x16x16xbf16, #tpu.memory_space<vmem>>, %arg5: memref<1x1x16x16xbf16, #tpu.memory_space<vmem>>, %arg6: memref<1x1x128xf32, #tpu.memory_space<vmem>>) attributes {dimension_semantics = [#tpu.dimension_semantics<parallel>], iteration_bounds = array<i64: 2>, scalar_prefetch = 0 : i64, scratch_operands = 0 : i64, tpu.core_type = #tpu.core_type<tc>, window_params = [{transform_indices = @transform_0, window_bounds = array<i64: 1>}, {pipeline_mode = #tpu.pipeline_mode<synchronous>, transform_indices = @transform_1, window_bounds = array<i64: 36, 128>}, {pipeline_mode = #tpu.pipeline_mode<synchronous>, transform_indices = @transform_2, window_bounds = array<i64: 1, 128>}, {transform_indices = @transform_3, window_bounds = array<i64: 1, 4, 16, 16>}, {transform_indices = @transform_4, window_bounds = array<i64: 1, 1, 16, 16>}, {transform_indices = @transform_5, window_bounds = array<i64: 1, 1, 128>}]} {
    %c0 = arith.constant 0 : index
    %c0_0 = arith.constant 0 : index
    %c0_1 = arith.constant 0 : index
    %c0_2 = arith.constant 0 : index
    %0 = vector.load %arg5[%c0, %c0_0, %c0_1, %c0_2] : memref<1x1x16x16xbf16, #tpu.memory_space<vmem>>, vector<1x1x16x16xbf16>
    %1 = vector.shape_cast %0 : vector<1x1x16x16xbf16> to vector<16x16xbf16>
    %2 = arith.extf %1 : vector<16x16xbf16> to vector<16x16xf32>
    %c0_3 = arith.constant 0 : index
    %3 = memref.load %arg1[%c0_3] : memref<1xf32, #tpu.memory_space<smem>>
    %cst = arith.constant 1.000000e+00 : f32
    %4 = vector.broadcast %cst : f32 to vector<16x16xf32>
    %5 = arith.subf %4, %2 : vector<16x16xf32>
    %6 = vector.broadcast %3 : f32 to vector<16x16xf32>
    %7 = arith.mulf %5, %6 : vector<16x16xf32>
    %8 = arith.addf %2, %7 : vector<16x16xf32>
    %9 = vector.shape_cast %8 : vector<16x16xf32> to vector<1x16x16xf32>
    %cst_4 = arith.constant dense<0.000000e+00> : vector<1xf32>
    %10 = vector.multi_reduction <add>, %9, %cst_4 [1, 2] : vector<1x16x16xf32> to vector<1xf32>
    %11 = vector.shape_cast %10 : vector<1xf32> to vector<1x1x1xf32>
    %12 = vector.extract %11[0, 0, 0] : f32 from vector<1x1x1xf32>
    %13 = vector.broadcast %12 : f32 to vector<1x1xf32>
    %cst_5 = arith.constant 3.906250e-03 : f32
    %14 = vector.broadcast %cst_5 : f32 to vector<1x1xf32>
    %15 = arith.mulf %13, %14 : vector<1x1xf32>
    %cst_6 = arith.constant 0.000000e+00 : f32
    %16 = vector.broadcast %cst_6 : f32 to vector<1x16xf32>
    %cst_7 = arith.constant 0.000000e+00 : f32
    %17 = vector.broadcast %cst_7 : f32 to vector<18x1xf32>
    %18 = tpu.concatenate %16, %8, %16 in 0 : vector<1x16xf32>, vector<16x16xf32>, vector<1x16xf32> -> vector<18x16xf32>
    %19 = tpu.concatenate %17, %18, %17 in 1 : vector<18x1xf32>, vector<18x16xf32>, vector<18x1xf32> -> vector<18x18xf32>
    %c0_8 = arith.constant 0 : index
    %c0_9 = arith.constant 0 : index
    %c0_10 = arith.constant 0 : index
    %c0_11 = arith.constant 0 : index
    %20 = vector.load %arg4[%c0_8, %c0_9, %c0_10, %c0_11] : memref<1x4x16x16xbf16, #tpu.memory_space<vmem>>, vector<1x1x16x16xbf16>
    %21 = vector.shape_cast %20 : vector<1x1x16x16xbf16> to vector<16x16xbf16>
    %22 = arith.extf %21 : vector<16x16xbf16> to vector<16x16xf32>
    %c0_12 = arith.constant 0 : index
    %c1 = arith.constant 1 : index
    %c0_13 = arith.constant 0 : index
    %c0_14 = arith.constant 0 : index
    %23 = vector.load %arg4[%c0_12, %c1, %c0_13, %c0_14] : memref<1x4x16x16xbf16, #tpu.memory_space<vmem>>, vector<1x1x16x16xbf16>
    %24 = vector.shape_cast %23 : vector<1x1x16x16xbf16> to vector<16x16xbf16>
    %25 = arith.extf %24 : vector<16x16xbf16> to vector<16x16xf32>
    %c0_15 = arith.constant 0 : index
    %c2 = arith.constant 2 : index
    %c0_16 = arith.constant 0 : index
    %c0_17 = arith.constant 0 : index
    %26 = vector.load %arg4[%c0_15, %c2, %c0_16, %c0_17] : memref<1x4x16x16xbf16, #tpu.memory_space<vmem>>, vector<1x1x16x16xbf16>
    %27 = vector.shape_cast %26 : vector<1x1x16x16xbf16> to vector<16x16xbf16>
    %28 = arith.extf %27 : vector<16x16xbf16> to vector<16x16xf32>
    %c0_18 = arith.constant 0 : index
    %c3 = arith.constant 3 : index
    %c0_19 = arith.constant 0 : index
    %c0_20 = arith.constant 0 : index
    %29 = vector.load %arg4[%c0_18, %c3, %c0_19, %c0_20] : memref<1x4x16x16xbf16, #tpu.memory_space<vmem>>, vector<1x1x16x16xbf16>
    %30 = vector.shape_cast %29 : vector<1x1x16x16xbf16> to vector<16x16xbf16>
    %31 = arith.extf %30 : vector<16x16xbf16> to vector<16x16xf32>
    %c0_21 = arith.constant 0 : index
    %c0_22 = arith.constant 0 : index
    %32 = vector.load %arg2[%c0_21, %c0_22] : memref<36x128xf32, #tpu.memory_space<vmem>>, vector<36x128xf32>
    %c0_23 = arith.constant 0 : index
    %c0_24 = arith.constant 0 : index
    %33 = vector.load %arg3[%c0_23, %c0_24] : memref<1x128xf32, #tpu.memory_space<vmem>>, vector<1x128xf32>
    %34 = vector.broadcast %15 : vector<1x1xf32> to vector<1x128xf32>
    %35 = arith.mulf %33, %34 : vector<1x128xf32>
    %36 = vector.extract_strided_slice %19 {offsets = [2, 2], sizes = [16, 16], strides = [1, 1]} : vector<18x18xf32> to vector<16x16xf32>
    %37 = arith.mulf %36, %22 : vector<16x16xf32>
    %38 = vector.shape_cast %37 : vector<16x16xf32> to vector<1x16x16xf32>
    %cst_25 = arith.constant dense<0.000000e+00> : vector<1xf32>
    %39 = vector.multi_reduction <add>, %38, %cst_25 [1, 2] : vector<1x16x16xf32> to vector<1xf32>
    %40 = vector.shape_cast %39 : vector<1xf32> to vector<1x1x1xf32>
    %41 = vector.extract %40[0, 0, 0] : f32 from vector<1x1x1xf32>
    %42 = vector.broadcast %41 : f32 to vector<1x1xf32>
    %cst_26 = arith.constant 3.906250e-03 : f32
    %43 = vector.broadcast %cst_26 : f32 to vector<1x1xf32>
    %44 = arith.mulf %42, %43 : vector<1x1xf32>
    %45 = vector.extract_strided_slice %32 {offsets = [0, 0], sizes = [1, 128], strides = [1, 1]} : vector<36x128xf32> to vector<1x128xf32>
    %46 = vector.broadcast %44 : vector<1x1xf32> to vector<1x128xf32>
    %47 = arith.mulf %46, %45 : vector<1x128xf32>
    %48 = arith.addf %35, %47 : vector<1x128xf32>
    %49 = arith.mulf %36, %25 : vector<16x16xf32>
    %50 = vector.shape_cast %49 : vector<16x16xf32> to vector<1x16x16xf32>
    %cst_27 = arith.constant dense<0.000000e+00> : vector<1xf32>
    %51 = vector.multi_reduction <add>, %50, %cst_27 [1, 2] : vector<1x16x16xf32> to vector<1xf32>
    %52 = vector.shape_cast %51 : vector<1xf32> to vector<1x1x1xf32>
    %53 = vector.extract %52[0, 0, 0] : f32 from vector<1x1x1xf32>
    %54 = vector.broadcast %53 : f32 to vector<1x1xf32>
    %cst_28 = arith.constant 3.906250e-03 : f32
    %55 = vector.broadcast %cst_28 : f32 to vector<1x1xf32>
    %56 = arith.mulf %54, %55 : vector<1x1xf32>
    %57 = vector.extract_strided_slice %32 {offsets = [1, 0], sizes = [1, 128], strides = [1, 1]} : vector<36x128xf32> to vector<1x128xf32>
    %58 = vector.broadcast %56 : vector<1x1xf32> to vector<1x128xf32>
    %59 = arith.mulf %58, %57 : vector<1x128xf32>
    %60 = arith.addf %48, %59 : vector<1x128xf32>
    %61 = arith.mulf %36, %28 : vector<16x16xf32>
    %62 = vector.shape_cast %61 : vector<16x16xf32> to vector<1x16x16xf32>
    %cst_29 = arith.constant dense<0.000000e+00> : vector<1xf32>
    %63 = vector.multi_reduction <add>, %62, %cst_29 [1, 2] : vector<1x16x16xf32> to vector<1xf32>
    %64 = vector.shape_cast %63 : vector<1xf32> to vector<1x1x1xf32>
    %65 = vector.extract %64[0, 0, 0] : f32 from vector<1x1x1xf32>
    %66 = vector.broadcast %65 : f32 to vector<1x1xf32>
    %cst_30 = arith.constant 3.906250e-03 : f32
    %67 = vector.broadcast %cst_30 : f32 to vector<1x1xf32>
    %68 = arith.mulf %66, %67 : vector<1x1xf32>
    %69 = vector.extract_strided_slice %32 {offsets = [2, 0], sizes = [1, 128], strides = [1, 1]} : vector<36x128xf32> to vector<1x128xf32>
    %70 = vector.broadcast %68 : vector<1x1xf32> to vector<1x128xf32>
    %71 = arith.mulf %70, %69 : vector<1x128xf32>
    %72 = arith.addf %60, %71 : vector<1x128xf32>
    %73 = arith.mulf %36, %31 : vector<16x16xf32>
    %74 = vector.shape_cast %73 : vector<16x16xf32> to vector<1x16x16xf32>
    %cst_31 = arith.constant dense<0.000000e+00> : vector<1xf32>
    %75 = vector.multi_reduction <add>, %74, %cst_31 [1, 2] : vector<1x16x16xf32> to vector<1xf32>
    %76 = vector.shape_cast %75 : vector<1xf32> to vector<1x1x1xf32>
    %77 = vector.extract %76[0, 0, 0] : f32 from vector<1x1x1xf32>
    %78 = vector.broadcast %77 : f32 to vector<1x1xf32>
    %cst_32 = arith.constant 3.906250e-03 : f32
    %79 = vector.broadcast %cst_32 : f32 to vector<1x1xf32>
    %80 = arith.mulf %78, %79 : vector<1x1xf32>
    %81 = vector.extract_strided_slice %32 {offsets = [3, 0], sizes = [1, 128], strides = [1, 1]} : vector<36x128xf32> to vector<1x128xf32>
    %82 = vector.broadcast %80 : vector<1x1xf32> to vector<1x128xf32>
    %83 = arith.mulf %82, %81 : vector<1x128xf32>
    %84 = arith.addf %72, %83 : vector<1x128xf32>
    %85 = vector.extract_strided_slice %19 {offsets = [2, 1], sizes = [16, 16], strides = [1, 1]} : vector<18x18xf32> to vector<16x16xf32>
    %86 = arith.mulf %85, %22 : vector<16x16xf32>
    %87 = vector.shape_cast %86 : vector<16x16xf32> to vector<1x16x16xf32>
    %cst_33 = arith.constant dense<0.000000e+00> : vector<1xf32>
    %88 = vector.multi_reduction <add>, %87, %cst_33 [1, 2] : vector<1x16x16xf32> to vector<1xf32>
    %89 = vector.shape_cast %88 : vector<1xf32> to vector<1x1x1xf32>
    %90 = vector.extract %89[0, 0, 0] : f32 from vector<1x1x1xf32>
    %91 = vector.broadcast %90 : f32 to vector<1x1xf32>
    %cst_34 = arith.constant 3.906250e-03 : f32
    %92 = vector.broadcast %cst_34 : f32 to vector<1x1xf32>
    %93 = arith.mulf %91, %92 : vector<1x1xf32>
    %94 = vector.extract_strided_slice %32 {offsets = [4, 0], sizes = [1, 128], strides = [1, 1]} : vector<36x128xf32> to vector<1x128xf32>
    %95 = vector.broadcast %93 : vector<1x1xf32> to vector<1x128xf32>
    %96 = arith.mulf %95, %94 : vector<1x128xf32>
    %97 = arith.addf %84, %96 : vector<1x128xf32>
    %98 = arith.mulf %85, %25 : vector<16x16xf32>
    %99 = vector.shape_cast %98 : vector<16x16xf32> to vector<1x16x16xf32>
    %cst_35 = arith.constant dense<0.000000e+00> : vector<1xf32>
    %100 = vector.multi_reduction <add>, %99, %cst_35 [1, 2] : vector<1x16x16xf32> to vector<1xf32>
    %101 = vector.shape_cast %100 : vector<1xf32> to vector<1x1x1xf32>
    %102 = vector.extract %101[0, 0, 0] : f32 from vector<1x1x1xf32>
    %103 = vector.broadcast %102 : f32 to vector<1x1xf32>
    %cst_36 = arith.constant 3.906250e-03 : f32
    %104 = vector.broadcast %cst_36 : f32 to vector<1x1xf32>
    %105 = arith.mulf %103, %104 : vector<1x1xf32>
    %106 = vector.extract_strided_slice %32 {offsets = [5, 0], sizes = [1, 128], strides = [1, 1]} : vector<36x128xf32> to vector<1x128xf32>
    %107 = vector.broadcast %105 : vector<1x1xf32> to vector<1x128xf32>
    %108 = arith.mulf %107, %106 : vector<1x128xf32>
    %109 = arith.addf %97, %108 : vector<1x128xf32>
    %110 = arith.mulf %85, %28 : vector<16x16xf32>
    %111 = vector.shape_cast %110 : vector<16x16xf32> to vector<1x16x16xf32>
    %cst_37 = arith.constant dense<0.000000e+00> : vector<1xf32>
    %112 = vector.multi_reduction <add>, %111, %cst_37 [1, 2] : vector<1x16x16xf32> to vector<1xf32>
    %113 = vector.shape_cast %112 : vector<1xf32> to vector<1x1x1xf32>
    %114 = vector.extract %113[0, 0, 0] : f32 from vector<1x1x1xf32>
    %115 = vector.broadcast %114 : f32 to vector<1x1xf32>
    %cst_38 = arith.constant 3.906250e-03 : f32
    %116 = vector.broadcast %cst_38 : f32 to vector<1x1xf32>
    %117 = arith.mulf %115, %116 : vector<1x1xf32>
    %118 = vector.extract_strided_slice %32 {offsets = [6, 0], sizes = [1, 128], strides = [1, 1]} : vector<36x128xf32> to vector<1x128xf32>
    %119 = vector.broadcast %117 : vector<1x1xf32> to vector<1x128xf32>
    %120 = arith.mulf %119, %118 : vector<1x128xf32>
    %121 = arith.addf %109, %120 : vector<1x128xf32>
    %122 = arith.mulf %85, %31 : vector<16x16xf32>
    %123 = vector.shape_cast %122 : vector<16x16xf32> to vector<1x16x16xf32>
    %cst_39 = arith.constant dense<0.000000e+00> : vector<1xf32>
    %124 = vector.multi_reduction <add>, %123, %cst_39 [1, 2] : vector<1x16x16xf32> to vector<1xf32>
    %125 = vector.shape_cast %124 : vector<1xf32> to vector<1x1x1xf32>
    %126 = vector.extract %125[0, 0, 0] : f32 from vector<1x1x1xf32>
    %127 = vector.broadcast %126 : f32 to vector<1x1xf32>
    %cst_40 = arith.constant 3.906250e-03 : f32
    %128 = vector.broadcast %cst_40 : f32 to vector<1x1xf32>
    %129 = arith.mulf %127, %128 : vector<1x1xf32>
    %130 = vector.extract_strided_slice %32 {offsets = [7, 0], sizes = [1, 128], strides = [1, 1]} : vector<36x128xf32> to vector<1x128xf32>
    %131 = vector.broadcast %129 : vector<1x1xf32> to vector<1x128xf32>
    %132 = arith.mulf %131, %130 : vector<1x128xf32>
    %133 = arith.addf %121, %132 : vector<1x128xf32>
    %134 = vector.extract_strided_slice %19 {offsets = [2, 0], sizes = [16, 16], strides = [1, 1]} : vector<18x18xf32> to vector<16x16xf32>
    %135 = arith.mulf %134, %22 : vector<16x16xf32>
    %136 = vector.shape_cast %135 : vector<16x16xf32> to vector<1x16x16xf32>
    %cst_41 = arith.constant dense<0.000000e+00> : vector<1xf32>
    %137 = vector.multi_reduction <add>, %136, %cst_41 [1, 2] : vector<1x16x16xf32> to vector<1xf32>
    %138 = vector.shape_cast %137 : vector<1xf32> to vector<1x1x1xf32>
    %139 = vector.extract %138[0, 0, 0] : f32 from vector<1x1x1xf32>
    %140 = vector.broadcast %139 : f32 to vector<1x1xf32>
    %cst_42 = arith.constant 3.906250e-03 : f32
    %141 = vector.broadcast %cst_42 : f32 to vector<1x1xf32>
    %142 = arith.mulf %140, %141 : vector<1x1xf32>
    %143 = vector.extract_strided_slice %32 {offsets = [8, 0], sizes = [1, 128], strides = [1, 1]} : vector<36x128xf32> to vector<1x128xf32>
    %144 = vector.broadcast %142 : vector<1x1xf32> to vector<1x128xf32>
    %145 = arith.mulf %144, %143 : vector<1x128xf32>
    %146 = arith.addf %133, %145 : vector<1x128xf32>
    %147 = arith.mulf %134, %25 : vector<16x16xf32>
    %148 = vector.shape_cast %147 : vector<16x16xf32> to vector<1x16x16xf32>
    %cst_43 = arith.constant dense<0.000000e+00> : vector<1xf32>
    %149 = vector.multi_reduction <add>, %148, %cst_43 [1, 2] : vector<1x16x16xf32> to vector<1xf32>
    %150 = vector.shape_cast %149 : vector<1xf32> to vector<1x1x1xf32>
    %151 = vector.extract %150[0, 0, 0] : f32 from vector<1x1x1xf32>
    %152 = vector.broadcast %151 : f32 to vector<1x1xf32>
    %cst_44 = arith.constant 3.906250e-03 : f32
    %153 = vector.broadcast %cst_44 : f32 to vector<1x1xf32>
    %154 = arith.mulf %152, %153 : vector<1x1xf32>
    %155 = vector.extract_strided_slice %32 {offsets = [9, 0], sizes = [1, 128], strides = [1, 1]} : vector<36x128xf32> to vector<1x128xf32>
    %156 = vector.broadcast %154 : vector<1x1xf32> to vector<1x128xf32>
    %157 = arith.mulf %156, %155 : vector<1x128xf32>
    %158 = arith.addf %146, %157 : vector<1x128xf32>
    %159 = arith.mulf %134, %28 : vector<16x16xf32>
    %160 = vector.shape_cast %159 : vector<16x16xf32> to vector<1x16x16xf32>
    %cst_45 = arith.constant dense<0.000000e+00> : vector<1xf32>
    %161 = vector.multi_reduction <add>, %160, %cst_45 [1, 2] : vector<1x16x16xf32> to vector<1xf32>
    %162 = vector.shape_cast %161 : vector<1xf32> to vector<1x1x1xf32>
    %163 = vector.extract %162[0, 0, 0] : f32 from vector<1x1x1xf32>
    %164 = vector.broadcast %163 : f32 to vector<1x1xf32>
    %cst_46 = arith.constant 3.906250e-03 : f32
    %165 = vector.broadcast %cst_46 : f32 to vector<1x1xf32>
    %166 = arith.mulf %164, %165 : vector<1x1xf32>
    %167 = vector.extract_strided_slice %32 {offsets = [10, 0], sizes = [1, 128], strides = [1, 1]} : vector<36x128xf32> to vector<1x128xf32>
    %168 = vector.broadcast %166 : vector<1x1xf32> to vector<1x128xf32>
    %169 = arith.mulf %168, %167 : vector<1x128xf32>
    %170 = arith.addf %158, %169 : vector<1x128xf32>
    %171 = arith.mulf %134, %31 : vector<16x16xf32>
    %172 = vector.shape_cast %171 : vector<16x16xf32> to vector<1x16x16xf32>
    %cst_47 = arith.constant dense<0.000000e+00> : vector<1xf32>
    %173 = vector.multi_reduction <add>, %172, %cst_47 [1, 2] : vector<1x16x16xf32> to vector<1xf32>
    %174 = vector.shape_cast %173 : vector<1xf32> to vector<1x1x1xf32>
    %175 = vector.extract %174[0, 0, 0] : f32 from vector<1x1x1xf32>
    %176 = vector.broadcast %175 : f32 to vector<1x1xf32>
    %cst_48 = arith.constant 3.906250e-03 : f32
    %177 = vector.broadcast %cst_48 : f32 to vector<1x1xf32>
    %178 = arith.mulf %176, %177 : vector<1x1xf32>
    %179 = vector.extract_strided_slice %32 {offsets = [11, 0], sizes = [1, 128], strides = [1, 1]} : vector<36x128xf32> to vector<1x128xf32>
    %180 = vector.broadcast %178 : vector<1x1xf32> to vector<1x128xf32>
    %181 = arith.mulf %180, %179 : vector<1x128xf32>
    %182 = arith.addf %170, %181 : vector<1x128xf32>
    %183 = vector.extract_strided_slice %19 {offsets = [1, 2], sizes = [16, 16], strides = [1, 1]} : vector<18x18xf32> to vector<16x16xf32>
    %184 = arith.mulf %183, %22 : vector<16x16xf32>
    %185 = vector.shape_cast %184 : vector<16x16xf32> to vector<1x16x16xf32>
    %cst_49 = arith.constant dense<0.000000e+00> : vector<1xf32>
    %186 = vector.multi_reduction <add>, %185, %cst_49 [1, 2] : vector<1x16x16xf32> to vector<1xf32>
    %187 = vector.shape_cast %186 : vector<1xf32> to vector<1x1x1xf32>
    %188 = vector.extract %187[0, 0, 0] : f32 from vector<1x1x1xf32>
    %189 = vector.broadcast %188 : f32 to vector<1x1xf32>
    %cst_50 = arith.constant 3.906250e-03 : f32
    %190 = vector.broadcast %cst_50 : f32 to vector<1x1xf32>
    %191 = arith.mulf %189, %190 : vector<1x1xf32>
    %192 = vector.extract_strided_slice %32 {offsets = [12, 0], sizes = [1, 128], strides = [1, 1]} : vector<36x128xf32> to vector<1x128xf32>
    %193 = vector.broadcast %191 : vector<1x1xf32> to vector<1x128xf32>
    %194 = arith.mulf %193, %192 : vector<1x128xf32>
    %195 = arith.addf %182, %194 : vector<1x128xf32>
    %196 = arith.mulf %183, %25 : vector<16x16xf32>
    %197 = vector.shape_cast %196 : vector<16x16xf32> to vector<1x16x16xf32>
    %cst_51 = arith.constant dense<0.000000e+00> : vector<1xf32>
    %198 = vector.multi_reduction <add>, %197, %cst_51 [1, 2] : vector<1x16x16xf32> to vector<1xf32>
    %199 = vector.shape_cast %198 : vector<1xf32> to vector<1x1x1xf32>
    %200 = vector.extract %199[0, 0, 0] : f32 from vector<1x1x1xf32>
    %201 = vector.broadcast %200 : f32 to vector<1x1xf32>
    %cst_52 = arith.constant 3.906250e-03 : f32
    %202 = vector.broadcast %cst_52 : f32 to vector<1x1xf32>
    %203 = arith.mulf %201, %202 : vector<1x1xf32>
    %204 = vector.extract_strided_slice %32 {offsets = [13, 0], sizes = [1, 128], strides = [1, 1]} : vector<36x128xf32> to vector<1x128xf32>
    %205 = vector.broadcast %203 : vector<1x1xf32> to vector<1x128xf32>
    %206 = arith.mulf %205, %204 : vector<1x128xf32>
    %207 = arith.addf %195, %206 : vector<1x128xf32>
    %208 = arith.mulf %183, %28 : vector<16x16xf32>
    %209 = vector.shape_cast %208 : vector<16x16xf32> to vector<1x16x16xf32>
    %cst_53 = arith.constant dense<0.000000e+00> : vector<1xf32>
    %210 = vector.multi_reduction <add>, %209, %cst_53 [1, 2] : vector<1x16x16xf32> to vector<1xf32>
    %211 = vector.shape_cast %210 : vector<1xf32> to vector<1x1x1xf32>
    %212 = vector.extract %211[0, 0, 0] : f32 from vector<1x1x1xf32>
    %213 = vector.broadcast %212 : f32 to vector<1x1xf32>
    %cst_54 = arith.constant 3.906250e-03 : f32
    %214 = vector.broadcast %cst_54 : f32 to vector<1x1xf32>
    %215 = arith.mulf %213, %214 : vector<1x1xf32>
    %216 = vector.extract_strided_slice %32 {offsets = [14, 0], sizes = [1, 128], strides = [1, 1]} : vector<36x128xf32> to vector<1x128xf32>
    %217 = vector.broadcast %215 : vector<1x1xf32> to vector<1x128xf32>
    %218 = arith.mulf %217, %216 : vector<1x128xf32>
    %219 = arith.addf %207, %218 : vector<1x128xf32>
    %220 = arith.mulf %183, %31 : vector<16x16xf32>
    %221 = vector.shape_cast %220 : vector<16x16xf32> to vector<1x16x16xf32>
    %cst_55 = arith.constant dense<0.000000e+00> : vector<1xf32>
    %222 = vector.multi_reduction <add>, %221, %cst_55 [1, 2] : vector<1x16x16xf32> to vector<1xf32>
    %223 = vector.shape_cast %222 : vector<1xf32> to vector<1x1x1xf32>
    %224 = vector.extract %223[0, 0, 0] : f32 from vector<1x1x1xf32>
    %225 = vector.broadcast %224 : f32 to vector<1x1xf32>
    %cst_56 = arith.constant 3.906250e-03 : f32
    %226 = vector.broadcast %cst_56 : f32 to vector<1x1xf32>
    %227 = arith.mulf %225, %226 : vector<1x1xf32>
    %228 = vector.extract_strided_slice %32 {offsets = [15, 0], sizes = [1, 128], strides = [1, 1]} : vector<36x128xf32> to vector<1x128xf32>
    %229 = vector.broadcast %227 : vector<1x1xf32> to vector<1x128xf32>
    %230 = arith.mulf %229, %228 : vector<1x128xf32>
    %231 = arith.addf %219, %230 : vector<1x128xf32>
    %232 = vector.extract_strided_slice %19 {offsets = [1, 1], sizes = [16, 16], strides = [1, 1]} : vector<18x18xf32> to vector<16x16xf32>
    %233 = arith.mulf %232, %22 : vector<16x16xf32>
    %234 = vector.shape_cast %233 : vector<16x16xf32> to vector<1x16x16xf32>
    %cst_57 = arith.constant dense<0.000000e+00> : vector<1xf32>
    %235 = vector.multi_reduction <add>, %234, %cst_57 [1, 2] : vector<1x16x16xf32> to vector<1xf32>
    %236 = vector.shape_cast %235 : vector<1xf32> to vector<1x1x1xf32>
    %237 = vector.extract %236[0, 0, 0] : f32 from vector<1x1x1xf32>
    %238 = vector.broadcast %237 : f32 to vector<1x1xf32>
    %cst_58 = arith.constant 3.906250e-03 : f32
    %239 = vector.broadcast %cst_58 : f32 to vector<1x1xf32>
    %240 = arith.mulf %238, %239 : vector<1x1xf32>
    %241 = vector.extract_strided_slice %32 {offsets = [16, 0], sizes = [1, 128], strides = [1, 1]} : vector<36x128xf32> to vector<1x128xf32>
    %242 = vector.broadcast %240 : vector<1x1xf32> to vector<1x128xf32>
    %243 = arith.mulf %242, %241 : vector<1x128xf32>
    %244 = arith.addf %231, %243 : vector<1x128xf32>
    %245 = arith.mulf %232, %25 : vector<16x16xf32>
    %246 = vector.shape_cast %245 : vector<16x16xf32> to vector<1x16x16xf32>
    %cst_59 = arith.constant dense<0.000000e+00> : vector<1xf32>
    %247 = vector.multi_reduction <add>, %246, %cst_59 [1, 2] : vector<1x16x16xf32> to vector<1xf32>
    %248 = vector.shape_cast %247 : vector<1xf32> to vector<1x1x1xf32>
    %249 = vector.extract %248[0, 0, 0] : f32 from vector<1x1x1xf32>
    %250 = vector.broadcast %249 : f32 to vector<1x1xf32>
    %cst_60 = arith.constant 3.906250e-03 : f32
    %251 = vector.broadcast %cst_60 : f32 to vector<1x1xf32>
    %252 = arith.mulf %250, %251 : vector<1x1xf32>
    %253 = vector.extract_strided_slice %32 {offsets = [17, 0], sizes = [1, 128], strides = [1, 1]} : vector<36x128xf32> to vector<1x128xf32>
    %254 = vector.broadcast %252 : vector<1x1xf32> to vector<1x128xf32>
    %255 = arith.mulf %254, %253 : vector<1x128xf32>
    %256 = arith.addf %244, %255 : vector<1x128xf32>
    %257 = arith.mulf %232, %28 : vector<16x16xf32>
    %258 = vector.shape_cast %257 : vector<16x16xf32> to vector<1x16x16xf32>
    %cst_61 = arith.constant dense<0.000000e+00> : vector<1xf32>
    %259 = vector.multi_reduction <add>, %258, %cst_61 [1, 2] : vector<1x16x16xf32> to vector<1xf32>
    %260 = vector.shape_cast %259 : vector<1xf32> to vector<1x1x1xf32>
    %261 = vector.extract %260[0, 0, 0] : f32 from vector<1x1x1xf32>
    %262 = vector.broadcast %261 : f32 to vector<1x1xf32>
    %cst_62 = arith.constant 3.906250e-03 : f32
    %263 = vector.broadcast %cst_62 : f32 to vector<1x1xf32>
    %264 = arith.mulf %262, %263 : vector<1x1xf32>
    %265 = vector.extract_strided_slice %32 {offsets = [18, 0], sizes = [1, 128], strides = [1, 1]} : vector<36x128xf32> to vector<1x128xf32>
    %266 = vector.broadcast %264 : vector<1x1xf32> to vector<1x128xf32>
    %267 = arith.mulf %266, %265 : vector<1x128xf32>
    %268 = arith.addf %256, %267 : vector<1x128xf32>
    %269 = arith.mulf %232, %31 : vector<16x16xf32>
    %270 = vector.shape_cast %269 : vector<16x16xf32> to vector<1x16x16xf32>
    %cst_63 = arith.constant dense<0.000000e+00> : vector<1xf32>
    %271 = vector.multi_reduction <add>, %270, %cst_63 [1, 2] : vector<1x16x16xf32> to vector<1xf32>
    %272 = vector.shape_cast %271 : vector<1xf32> to vector<1x1x1xf32>
    %273 = vector.extract %272[0, 0, 0] : f32 from vector<1x1x1xf32>
    %274 = vector.broadcast %273 : f32 to vector<1x1xf32>
    %cst_64 = arith.constant 3.906250e-03 : f32
    %275 = vector.broadcast %cst_64 : f32 to vector<1x1xf32>
    %276 = arith.mulf %274, %275 : vector<1x1xf32>
    %277 = vector.extract_strided_slice %32 {offsets = [19, 0], sizes = [1, 128], strides = [1, 1]} : vector<36x128xf32> to vector<1x128xf32>
    %278 = vector.broadcast %276 : vector<1x1xf32> to vector<1x128xf32>
    %279 = arith.mulf %278, %277 : vector<1x128xf32>
    %280 = arith.addf %268, %279 : vector<1x128xf32>
    %281 = vector.extract_strided_slice %19 {offsets = [1, 0], sizes = [16, 16], strides = [1, 1]} : vector<18x18xf32> to vector<16x16xf32>
    %282 = arith.mulf %281, %22 : vector<16x16xf32>
    %283 = vector.shape_cast %282 : vector<16x16xf32> to vector<1x16x16xf32>
    %cst_65 = arith.constant dense<0.000000e+00> : vector<1xf32>
    %284 = vector.multi_reduction <add>, %283, %cst_65 [1, 2] : vector<1x16x16xf32> to vector<1xf32>
    %285 = vector.shape_cast %284 : vector<1xf32> to vector<1x1x1xf32>
    %286 = vector.extract %285[0, 0, 0] : f32 from vector<1x1x1xf32>
    %287 = vector.broadcast %286 : f32 to vector<1x1xf32>
    %cst_66 = arith.constant 3.906250e-03 : f32
    %288 = vector.broadcast %cst_66 : f32 to vector<1x1xf32>
    %289 = arith.mulf %287, %288 : vector<1x1xf32>
    %290 = vector.extract_strided_slice %32 {offsets = [20, 0], sizes = [1, 128], strides = [1, 1]} : vector<36x128xf32> to vector<1x128xf32>
    %291 = vector.broadcast %289 : vector<1x1xf32> to vector<1x128xf32>
    %292 = arith.mulf %291, %290 : vector<1x128xf32>
    %293 = arith.addf %280, %292 : vector<1x128xf32>
    %294 = arith.mulf %281, %25 : vector<16x16xf32>
    %295 = vector.shape_cast %294 : vector<16x16xf32> to vector<1x16x16xf32>
    %cst_67 = arith.constant dense<0.000000e+00> : vector<1xf32>
    %296 = vector.multi_reduction <add>, %295, %cst_67 [1, 2] : vector<1x16x16xf32> to vector<1xf32>
    %297 = vector.shape_cast %296 : vector<1xf32> to vector<1x1x1xf32>
    %298 = vector.extract %297[0, 0, 0] : f32 from vector<1x1x1xf32>
    %299 = vector.broadcast %298 : f32 to vector<1x1xf32>
    %cst_68 = arith.constant 3.906250e-03 : f32
    %300 = vector.broadcast %cst_68 : f32 to vector<1x1xf32>
    %301 = arith.mulf %299, %300 : vector<1x1xf32>
    %302 = vector.extract_strided_slice %32 {offsets = [21, 0], sizes = [1, 128], strides = [1, 1]} : vector<36x128xf32> to vector<1x128xf32>
    %303 = vector.broadcast %301 : vector<1x1xf32> to vector<1x128xf32>
    %304 = arith.mulf %303, %302 : vector<1x128xf32>
    %305 = arith.addf %293, %304 : vector<1x128xf32>
    %306 = arith.mulf %281, %28 : vector<16x16xf32>
    %307 = vector.shape_cast %306 : vector<16x16xf32> to vector<1x16x16xf32>
    %cst_69 = arith.constant dense<0.000000e+00> : vector<1xf32>
    %308 = vector.multi_reduction <add>, %307, %cst_69 [1, 2] : vector<1x16x16xf32> to vector<1xf32>
    %309 = vector.shape_cast %308 : vector<1xf32> to vector<1x1x1xf32>
    %310 = vector.extract %309[0, 0, 0] : f32 from vector<1x1x1xf32>
    %311 = vector.broadcast %310 : f32 to vector<1x1xf32>
    %cst_70 = arith.constant 3.906250e-03 : f32
    %312 = vector.broadcast %cst_70 : f32 to vector<1x1xf32>
    %313 = arith.mulf %311, %312 : vector<1x1xf32>
    %314 = vector.extract_strided_slice %32 {offsets = [22, 0], sizes = [1, 128], strides = [1, 1]} : vector<36x128xf32> to vector<1x128xf32>
    %315 = vector.broadcast %313 : vector<1x1xf32> to vector<1x128xf32>
    %316 = arith.mulf %315, %314 : vector<1x128xf32>
    %317 = arith.addf %305, %316 : vector<1x128xf32>
    %318 = arith.mulf %281, %31 : vector<16x16xf32>
    %319 = vector.shape_cast %318 : vector<16x16xf32> to vector<1x16x16xf32>
    %cst_71 = arith.constant dense<0.000000e+00> : vector<1xf32>
    %320 = vector.multi_reduction <add>, %319, %cst_71 [1, 2] : vector<1x16x16xf32> to vector<1xf32>
    %321 = vector.shape_cast %320 : vector<1xf32> to vector<1x1x1xf32>
    %322 = vector.extract %321[0, 0, 0] : f32 from vector<1x1x1xf32>
    %323 = vector.broadcast %322 : f32 to vector<1x1xf32>
    %cst_72 = arith.constant 3.906250e-03 : f32
    %324 = vector.broadcast %cst_72 : f32 to vector<1x1xf32>
    %325 = arith.mulf %323, %324 : vector<1x1xf32>
    %326 = vector.extract_strided_slice %32 {offsets = [23, 0], sizes = [1, 128], strides = [1, 1]} : vector<36x128xf32> to vector<1x128xf32>
    %327 = vector.broadcast %325 : vector<1x1xf32> to vector<1x128xf32>
    %328 = arith.mulf %327, %326 : vector<1x128xf32>
    %329 = arith.addf %317, %328 : vector<1x128xf32>
    %330 = vector.extract_strided_slice %19 {offsets = [0, 2], sizes = [16, 16], strides = [1, 1]} : vector<18x18xf32> to vector<16x16xf32>
    %331 = arith.mulf %330, %22 : vector<16x16xf32>
    %332 = vector.shape_cast %331 : vector<16x16xf32> to vector<1x16x16xf32>
    %cst_73 = arith.constant dense<0.000000e+00> : vector<1xf32>
    %333 = vector.multi_reduction <add>, %332, %cst_73 [1, 2] : vector<1x16x16xf32> to vector<1xf32>
    %334 = vector.shape_cast %333 : vector<1xf32> to vector<1x1x1xf32>
    %335 = vector.extract %334[0, 0, 0] : f32 from vector<1x1x1xf32>
    %336 = vector.broadcast %335 : f32 to vector<1x1xf32>
    %cst_74 = arith.constant 3.906250e-03 : f32
    %337 = vector.broadcast %cst_74 : f32 to vector<1x1xf32>
    %338 = arith.mulf %336, %337 : vector<1x1xf32>
    %339 = vector.extract_strided_slice %32 {offsets = [24, 0], sizes = [1, 128], strides = [1, 1]} : vector<36x128xf32> to vector<1x128xf32>
    %340 = vector.broadcast %338 : vector<1x1xf32> to vector<1x128xf32>
    %341 = arith.mulf %340, %339 : vector<1x128xf32>
    %342 = arith.addf %329, %341 : vector<1x128xf32>
    %343 = arith.mulf %330, %25 : vector<16x16xf32>
    %344 = vector.shape_cast %343 : vector<16x16xf32> to vector<1x16x16xf32>
    %cst_75 = arith.constant dense<0.000000e+00> : vector<1xf32>
    %345 = vector.multi_reduction <add>, %344, %cst_75 [1, 2] : vector<1x16x16xf32> to vector<1xf32>
    %346 = vector.shape_cast %345 : vector<1xf32> to vector<1x1x1xf32>
    %347 = vector.extract %346[0, 0, 0] : f32 from vector<1x1x1xf32>
    %348 = vector.broadcast %347 : f32 to vector<1x1xf32>
    %cst_76 = arith.constant 3.906250e-03 : f32
    %349 = vector.broadcast %cst_76 : f32 to vector<1x1xf32>
    %350 = arith.mulf %348, %349 : vector<1x1xf32>
    %351 = vector.extract_strided_slice %32 {offsets = [25, 0], sizes = [1, 128], strides = [1, 1]} : vector<36x128xf32> to vector<1x128xf32>
    %352 = vector.broadcast %350 : vector<1x1xf32> to vector<1x128xf32>
    %353 = arith.mulf %352, %351 : vector<1x128xf32>
    %354 = arith.addf %342, %353 : vector<1x128xf32>
    %355 = arith.mulf %330, %28 : vector<16x16xf32>
    %356 = vector.shape_cast %355 : vector<16x16xf32> to vector<1x16x16xf32>
    %cst_77 = arith.constant dense<0.000000e+00> : vector<1xf32>
    %357 = vector.multi_reduction <add>, %356, %cst_77 [1, 2] : vector<1x16x16xf32> to vector<1xf32>
    %358 = vector.shape_cast %357 : vector<1xf32> to vector<1x1x1xf32>
    %359 = vector.extract %358[0, 0, 0] : f32 from vector<1x1x1xf32>
    %360 = vector.broadcast %359 : f32 to vector<1x1xf32>
    %cst_78 = arith.constant 3.906250e-03 : f32
    %361 = vector.broadcast %cst_78 : f32 to vector<1x1xf32>
    %362 = arith.mulf %360, %361 : vector<1x1xf32>
    %363 = vector.extract_strided_slice %32 {offsets = [26, 0], sizes = [1, 128], strides = [1, 1]} : vector<36x128xf32> to vector<1x128xf32>
    %364 = vector.broadcast %362 : vector<1x1xf32> to vector<1x128xf32>
    %365 = arith.mulf %364, %363 : vector<1x128xf32>
    %366 = arith.addf %354, %365 : vector<1x128xf32>
    %367 = arith.mulf %330, %31 : vector<16x16xf32>
    %368 = vector.shape_cast %367 : vector<16x16xf32> to vector<1x16x16xf32>
    %cst_79 = arith.constant dense<0.000000e+00> : vector<1xf32>
    %369 = vector.multi_reduction <add>, %368, %cst_79 [1, 2] : vector<1x16x16xf32> to vector<1xf32>
    %370 = vector.shape_cast %369 : vector<1xf32> to vector<1x1x1xf32>
    %371 = vector.extract %370[0, 0, 0] : f32 from vector<1x1x1xf32>
    %372 = vector.broadcast %371 : f32 to vector<1x1xf32>
    %cst_80 = arith.constant 3.906250e-03 : f32
    %373 = vector.broadcast %cst_80 : f32 to vector<1x1xf32>
    %374 = arith.mulf %372, %373 : vector<1x1xf32>
    %375 = vector.extract_strided_slice %32 {offsets = [27, 0], sizes = [1, 128], strides = [1, 1]} : vector<36x128xf32> to vector<1x128xf32>
    %376 = vector.broadcast %374 : vector<1x1xf32> to vector<1x128xf32>
    %377 = arith.mulf %376, %375 : vector<1x128xf32>
    %378 = arith.addf %366, %377 : vector<1x128xf32>
    %379 = vector.extract_strided_slice %19 {offsets = [0, 1], sizes = [16, 16], strides = [1, 1]} : vector<18x18xf32> to vector<16x16xf32>
    %380 = arith.mulf %379, %22 : vector<16x16xf32>
    %381 = vector.shape_cast %380 : vector<16x16xf32> to vector<1x16x16xf32>
    %cst_81 = arith.constant dense<0.000000e+00> : vector<1xf32>
    %382 = vector.multi_reduction <add>, %381, %cst_81 [1, 2] : vector<1x16x16xf32> to vector<1xf32>
    %383 = vector.shape_cast %382 : vector<1xf32> to vector<1x1x1xf32>
    %384 = vector.extract %383[0, 0, 0] : f32 from vector<1x1x1xf32>
    %385 = vector.broadcast %384 : f32 to vector<1x1xf32>
    %cst_82 = arith.constant 3.906250e-03 : f32
    %386 = vector.broadcast %cst_82 : f32 to vector<1x1xf32>
    %387 = arith.mulf %385, %386 : vector<1x1xf32>
    %388 = vector.extract_strided_slice %32 {offsets = [28, 0], sizes = [1, 128], strides = [1, 1]} : vector<36x128xf32> to vector<1x128xf32>
    %389 = vector.broadcast %387 : vector<1x1xf32> to vector<1x128xf32>
    %390 = arith.mulf %389, %388 : vector<1x128xf32>
    %391 = arith.addf %378, %390 : vector<1x128xf32>
    %392 = arith.mulf %379, %25 : vector<16x16xf32>
    %393 = vector.shape_cast %392 : vector<16x16xf32> to vector<1x16x16xf32>
    %cst_83 = arith.constant dense<0.000000e+00> : vector<1xf32>
    %394 = vector.multi_reduction <add>, %393, %cst_83 [1, 2] : vector<1x16x16xf32> to vector<1xf32>
    %395 = vector.shape_cast %394 : vector<1xf32> to vector<1x1x1xf32>
    %396 = vector.extract %395[0, 0, 0] : f32 from vector<1x1x1xf32>
    %397 = vector.broadcast %396 : f32 to vector<1x1xf32>
    %cst_84 = arith.constant 3.906250e-03 : f32
    %398 = vector.broadcast %cst_84 : f32 to vector<1x1xf32>
    %399 = arith.mulf %397, %398 : vector<1x1xf32>
    %400 = vector.extract_strided_slice %32 {offsets = [29, 0], sizes = [1, 128], strides = [1, 1]} : vector<36x128xf32> to vector<1x128xf32>
    %401 = vector.broadcast %399 : vector<1x1xf32> to vector<1x128xf32>
    %402 = arith.mulf %401, %400 : vector<1x128xf32>
    %403 = arith.addf %391, %402 : vector<1x128xf32>
    %404 = arith.mulf %379, %28 : vector<16x16xf32>
    %405 = vector.shape_cast %404 : vector<16x16xf32> to vector<1x16x16xf32>
    %cst_85 = arith.constant dense<0.000000e+00> : vector<1xf32>
    %406 = vector.multi_reduction <add>, %405, %cst_85 [1, 2] : vector<1x16x16xf32> to vector<1xf32>
    %407 = vector.shape_cast %406 : vector<1xf32> to vector<1x1x1xf32>
    %408 = vector.extract %407[0, 0, 0] : f32 from vector<1x1x1xf32>
    %409 = vector.broadcast %408 : f32 to vector<1x1xf32>
    %cst_86 = arith.constant 3.906250e-03 : f32
    %410 = vector.broadcast %cst_86 : f32 to vector<1x1xf32>
    %411 = arith.mulf %409, %410 : vector<1x1xf32>
    %412 = vector.extract_strided_slice %32 {offsets = [30, 0], sizes = [1, 128], strides = [1, 1]} : vector<36x128xf32> to vector<1x128xf32>
    %413 = vector.broadcast %411 : vector<1x1xf32> to vector<1x128xf32>
    %414 = arith.mulf %413, %412 : vector<1x128xf32>
    %415 = arith.addf %403, %414 : vector<1x128xf32>
    %416 = arith.mulf %379, %31 : vector<16x16xf32>
    %417 = vector.shape_cast %416 : vector<16x16xf32> to vector<1x16x16xf32>
    %cst_87 = arith.constant dense<0.000000e+00> : vector<1xf32>
    %418 = vector.multi_reduction <add>, %417, %cst_87 [1, 2] : vector<1x16x16xf32> to vector<1xf32>
    %419 = vector.shape_cast %418 : vector<1xf32> to vector<1x1x1xf32>
    %420 = vector.extract %419[0, 0, 0] : f32 from vector<1x1x1xf32>
    %421 = vector.broadcast %420 : f32 to vector<1x1xf32>
    %cst_88 = arith.constant 3.906250e-03 : f32
    %422 = vector.broadcast %cst_88 : f32 to vector<1x1xf32>
    %423 = arith.mulf %421, %422 : vector<1x1xf32>
    %424 = vector.extract_strided_slice %32 {offsets = [31, 0], sizes = [1, 128], strides = [1, 1]} : vector<36x128xf32> to vector<1x128xf32>
    %425 = vector.broadcast %423 : vector<1x1xf32> to vector<1x128xf32>
    %426 = arith.mulf %425, %424 : vector<1x128xf32>
    %427 = arith.addf %415, %426 : vector<1x128xf32>
    %428 = vector.extract_strided_slice %19 {offsets = [0, 0], sizes = [16, 16], strides = [1, 1]} : vector<18x18xf32> to vector<16x16xf32>
    %429 = arith.mulf %428, %22 : vector<16x16xf32>
    %430 = vector.shape_cast %429 : vector<16x16xf32> to vector<1x16x16xf32>
    %cst_89 = arith.constant dense<0.000000e+00> : vector<1xf32>
    %431 = vector.multi_reduction <add>, %430, %cst_89 [1, 2] : vector<1x16x16xf32> to vector<1xf32>
    %432 = vector.shape_cast %431 : vector<1xf32> to vector<1x1x1xf32>
    %433 = vector.extract %432[0, 0, 0] : f32 from vector<1x1x1xf32>
    %434 = vector.broadcast %433 : f32 to vector<1x1xf32>
    %cst_90 = arith.constant 3.906250e-03 : f32
    %435 = vector.broadcast %cst_90 : f32 to vector<1x1xf32>
    %436 = arith.mulf %434, %435 : vector<1x1xf32>
    %437 = vector.extract_strided_slice %32 {offsets = [32, 0], sizes = [1, 128], strides = [1, 1]} : vector<36x128xf32> to vector<1x128xf32>
    %438 = vector.broadcast %436 : vector<1x1xf32> to vector<1x128xf32>
    %439 = arith.mulf %438, %437 : vector<1x128xf32>
    %440 = arith.addf %427, %439 : vector<1x128xf32>
    %441 = arith.mulf %428, %25 : vector<16x16xf32>
    %442 = vector.shape_cast %441 : vector<16x16xf32> to vector<1x16x16xf32>
    %cst_91 = arith.constant dense<0.000000e+00> : vector<1xf32>
    %443 = vector.multi_reduction <add>, %442, %cst_91 [1, 2] : vector<1x16x16xf32> to vector<1xf32>
    %444 = vector.shape_cast %443 : vector<1xf32> to vector<1x1x1xf32>
    %445 = vector.extract %444[0, 0, 0] : f32 from vector<1x1x1xf32>
    %446 = vector.broadcast %445 : f32 to vector<1x1xf32>
    %cst_92 = arith.constant 3.906250e-03 : f32
    %447 = vector.broadcast %cst_92 : f32 to vector<1x1xf32>
    %448 = arith.mulf %446, %447 : vector<1x1xf32>
    %449 = vector.extract_strided_slice %32 {offsets = [33, 0], sizes = [1, 128], strides = [1, 1]} : vector<36x128xf32> to vector<1x128xf32>
    %450 = vector.broadcast %448 : vector<1x1xf32> to vector<1x128xf32>
    %451 = arith.mulf %450, %449 : vector<1x128xf32>
    %452 = arith.addf %440, %451 : vector<1x128xf32>
    %453 = arith.mulf %428, %28 : vector<16x16xf32>
    %454 = vector.shape_cast %453 : vector<16x16xf32> to vector<1x16x16xf32>
    %cst_93 = arith.constant dense<0.000000e+00> : vector<1xf32>
    %455 = vector.multi_reduction <add>, %454, %cst_93 [1, 2] : vector<1x16x16xf32> to vector<1xf32>
    %456 = vector.shape_cast %455 : vector<1xf32> to vector<1x1x1xf32>
    %457 = vector.extract %456[0, 0, 0] : f32 from vector<1x1x1xf32>
    %458 = vector.broadcast %457 : f32 to vector<1x1xf32>
    %cst_94 = arith.constant 3.906250e-03 : f32
    %459 = vector.broadcast %cst_94 : f32 to vector<1x1xf32>
    %460 = arith.mulf %458, %459 : vector<1x1xf32>
    %461 = vector.extract_strided_slice %32 {offsets = [34, 0], sizes = [1, 128], strides = [1, 1]} : vector<36x128xf32> to vector<1x128xf32>
    %462 = vector.broadcast %460 : vector<1x1xf32> to vector<1x128xf32>
    %463 = arith.mulf %462, %461 : vector<1x128xf32>
    %464 = arith.addf %452, %463 : vector<1x128xf32>
    %465 = arith.mulf %428, %31 : vector<16x16xf32>
    %466 = vector.shape_cast %465 : vector<16x16xf32> to vector<1x16x16xf32>
    %cst_95 = arith.constant dense<0.000000e+00> : vector<1xf32>
    %467 = vector.multi_reduction <add>, %466, %cst_95 [1, 2] : vector<1x16x16xf32> to vector<1xf32>
    %468 = vector.shape_cast %467 : vector<1xf32> to vector<1x1x1xf32>
    %469 = vector.extract %468[0, 0, 0] : f32 from vector<1x1x1xf32>
    %470 = vector.broadcast %469 : f32 to vector<1x1xf32>
    %cst_96 = arith.constant 3.906250e-03 : f32
    %471 = vector.broadcast %cst_96 : f32 to vector<1x1xf32>
    %472 = arith.mulf %470, %471 : vector<1x1xf32>
    %473 = vector.extract_strided_slice %32 {offsets = [35, 0], sizes = [1, 128], strides = [1, 1]} : vector<36x128xf32> to vector<1x128xf32>
    %474 = vector.broadcast %472 : vector<1x1xf32> to vector<1x128xf32>
    %475 = arith.mulf %474, %473 : vector<1x128xf32>
    %476 = arith.addf %464, %475 : vector<1x128xf32>
    %c0_97 = arith.constant 0 : index
    %c0_98 = arith.constant 0 : index
    %c0_99 = arith.constant 0 : index
    %477 = vector.load %arg6[%c0_97, %c0_98, %c0_99] : memref<1x1x128xf32, #tpu.memory_space<vmem>>, vector<1x1x128xf32>
    %478 = vector.shape_cast %477 : vector<1x1x128xf32> to vector<1x128xf32>
    %479 = vector.shape_cast %476 : vector<1x128xf32> to vector<1x1x128xf32>
    tpu.vector_store %arg6[%c0_97, %c0_98, %c0_99], %479 {strides = array<i32>} : memref<1x1x128xf32, #tpu.memory_space<vmem>>, vector<1x1x128xf32>,
    return
  }
  func.func @transform_0(%arg0: i32) -> i32 {
    %c0_i32 = arith.constant 0 : i32
    %c0_i32_0 = arith.constant 0 : i32
    return %c0_i32 : i32
  }
  func.func @transform_1(%arg0: i32) -> (i32, i32) {
    %c0_i32 = arith.constant 0 : i32
    %c0_i32_0 = arith.constant 0 : i32
    %c0_i32_1 = arith.constant 0 : i32
    return %c0_i32, %c0_i32_0 : i32, i32
  }
  func.func @transform_2(%arg0: i32) -> (i32, i32) {
    %c0_i32 = arith.constant 0 : i32
    %c0_i32_0 = arith.constant 0 : i32
    %c0_i32_1 = arith.constant 0 : i32
    return %c0_i32, %c0_i32_0 : i32, i32
  }
  func.func @transform_3(%arg0: i32) -> (i32, i32, i32, i32) {
    %c0_i32 = arith.constant 0 : i32
    %c0_i32_0 = arith.constant 0 : i32
    %c0_i32_1 = arith.constant 0 : i32
    %c0_i32_2 = arith.constant 0 : i32
    return %arg0, %c0_i32, %c0_i32_0, %c0_i32_1 : i32, i32, i32, i32
  }
  func.func @transform_4(%arg0: i32) -> (i32, i32, i32, i32) {
    %c0_i32 = arith.constant 0 : i32
    %c0_i32_0 = arith.constant 0 : i32
    %c0_i32_1 = arith.constant 0 : i32
    %c0_i32_2 = arith.constant 0 : i32
    return %arg0, %c0_i32, %c0_i32_0, %c0_i32_1 : i32, i32, i32, i32
  }
  func.func @transform_5(%arg0: i32) -> (i32, i32, i32) {
    %c0_i32 = arith.constant 0 : i32
    %c0_i32_0 = arith.constant 0 : i32
    %c0_i32_1 = arith.constant 0 : i32
    return %arg0, %c0_i32, %c0_i32_0 : i32, i32, i32
  }
}

</mosaic_0001>

<bundles_post_ra>
// kernel: tpu_custom_call.1
= control target key start
LH: loop header
LB: loop body
LE: loop exit
PB: predicated region body
PF: predicated region fallthrough
CT: control target
= control target key end

     0   :  { %s3321_s0 = inlined_call_operand.<no memory space> [shape: f32[1], index: 0, kind: input, shape index: {}]   ;;  %s3322_s1 = inlined_call_operand.hbm [shape: f32[36,128], index: 1, kind: input, shape index: {}]   ;;  %s3323_s2 = inlined_call_operand.vmem [shape: f32[1,128], index: 2, kind: input, shape index: {}]   ;;  %s3324_s3 = inlined_call_operand.hbm [shape: bf16[2,4,16,16], index: 3, kind: input, shape index: {}]   ;;  %s3325_s4 = inlined_call_operand.hbm [shape: bf16[2,1,16,16], index: 4, kind: input, shape index: {}]   ;;  %s3326_s5 = inlined_call_operand.hbm [shape: f32[2,1,128], index: 5, kind: output, shape index: {}]  }
   0x1   :  { %3329 = sst [smem:[#allocation13_spill]] %s3322_s1 }
   0x2   :  { %3330 = sst [smem:[#allocation14_spill]] %s3324_s3 }
   0x3   :  { %10 = sst [smem:[#allocation2]] %s3321_s0 }
   0x4   :  { %11 = vsyncpa [#allocation4], 0 }
   0x5   :  { %12 = vsyncpa [#allocation7], 0 }
   0x6   :  { %14 = vsyncpa [#allocation7 + $0x1], 0 }
   0x7   :  { %15 = vsyncpa [#allocation5], 0 }
   0x8   :  { %17 = vsyncpa [#allocation5 + $0x1], 0  ;;  %s2498_s20 = smov 0   ;;  %s2500_s21 = smov 0  }
   0x9   :  { %s2502_s22 = smov 0   ;;  %s2504_s23 = smov 0  }
   0xa LB: > { %s2519_s0 = sadd.s32 1, %s2454_s23   ;;  %s93_s24 = sadd.s32 1, %s2450_s22  ;;  %s2454_s23 = sphi %s2504_s23, %s3344_s23   ;;  %s2450_s22 = sphi %s2502_s22, %s3343_s22   ;;  %s2446_s21 = sphi %s2500_s21, %s3342_s21   ;;  %s2442_s20 = sphi %s2498_s20, %s3341_s20  }
   0xb   : > { %s90_s25 = ssub.s32 %s2454_s23, %s2519_s0  ;;  %p100_p0 = scmp.ne.s32.totalorder %s2450_s22, %s2446_s21 }
   0xc   : > { %p91_p1 = scmp.eq.s32.totalorder %s90_s25, 0  ;;  %p101_p2 = scmp.eq.s32.totalorder %s2454_s23, 0 }
   0xd   : > { %p2088_p4 = scmp.lt.s32.totalorder %s2454_s23, 2  ;;  %s202_s27 = sand.u32 1, %s2454_s23  }
   0xe   : > { %s2530_s26 = scalar_select %p91_p1, %s2450_s22, %s93_s24  }
   0xf   : > { %p102_p5 = por %p101_p2, %p100_p0  ;;  %s204_s28 = sand.u32 1, %s2450_s22  }
  0x10   : > { %s1945_s29 = sshll.u32 %s204_s28, 5  ;;  %s1963_s30 = sshll.u32 %s2454_s23, 5 }
  0x11   : > { %s3331_s3 = sld [smem:[#allocation14_spill]]  ;;  %s206_s10 = scalar_lea.vmem [#allocation6], %s1945_s29 }
  0x12   : > { %s214_s11 = sshll.u32 %s206_s10, 4  ;;  %p2543_p6 = pnand %p2088_p4, %p102_p5  ;;  %s215_s11 = int_to_ptr.vmem [resolvable:$true] %s214_s11 }
  0x13   : > { %s1948_s13 = sshll.u32 %s204_s28, 3  ;;  %s2547_s14 = scalar_lea.sflag [#allocation7], %s202_s27 }
  0x14   : > { %p2298_p8 = pneg %p2543_p6 }
  0x17   : > { %s211_s8 = scalar_lea.hbm %s3331_s3, %s1963_s30  ;;  %s2301_s19 = scalar_lea.hbm %s3331_s3, 64 }
  0x18   : > { %s212_s9 = sshll.u32 %s211_s8, 4  ;;  %s213_s9 = int_to_ptr.hbm [resolvable:$true] %s212_s9 }
  0x19   : > { %s2294_s15 = sshra.s32 %s213_s9, 4  ;;  %s2295_s15 = int_to_ptr.hbm [resolvable:$true] %s2294_s15 }
  0x1a   : > { %s2296_s16 = scalar_lea.hbm %s2295_s15, 32  ;;  %p2302_p11 = scmp.lt.s32.totalorder %s2295_s15, %s3331_s3 }
  0x1b   : > { %p2297_p7 = scmp.ne.s32.totalorder %s2295_s15, %s2296_s16  ;;  %p2303_p12 = scmp.lt.s32.totalorder %s2301_s19, %s2296_s16 }
  0x1d   : > { %p2299_p9 = pnand %p2298_p8, %p2297_p7  ;;  %p2304_p13 = por %p2303_p12, %p2302_p11 }
  0x1f   : > { %p2300_p10 = pneg %p2299_p9 }
  0x21   : > { %p2305_p1 = pnand %p2304_p13, %p2300_p10 }
  0x23   : > { %2308 = shalt.err (!%p2305_p1)
}
  0x24   : > { %s3327_s27 = smov 64   ;;  %s3328_s28 = smov 4  }
  0x25   : > { %2079 = dma.hbm_to_vmem [thread:$0]  (!%p2543_p6), %s213_s9, 512, %s215_s11, %s2547_s14, %s3327_s27, %s3327_s27, %s3328_s28  }
  0x26   : > { %s228_s29 = scalar_lea.vmem [#allocation8], %s1948_s13  ;;  %s2569_s6 = sadd.s32 4294967295, %s2454_s23  }
  0x27   : > { %s2566_s30 = sshll.u32 %s228_s29, 4  ;;  %s1941_s7 = sadd.s32 4294967294, %s2454_s23   ;;  %s237_s30 = int_to_ptr.vmem [resolvable:$true] %s2566_s30 }
  0x28   : > { %p106_p2 = scmp.ne.s32.totalorder %s2446_s21, %s2442_s20  ;;  %p107_p4 = scmp.eq.s32.totalorder %s2569_s6, 0 }
  0x29   : > { %p156_p5 = scmp.eq.s32.totalorder %s2569_s6, 1  ;;  %p162_p7 = scmp.eq.s32.totalorder %s1941_s7, 1 }
  0x2a   : > { %p1942_p9 = scmp.ge.s32.totalorder %s2454_s23, 1  ;;  %p2579_p10 = por %p107_p4, %p106_p2 }
  0x2b   : > { %p2586_p11 = por %p156_p5, %p100_p0  ;;  %p2590_p12 = por %p162_p7, %p106_p2 }
  0x2c   : > { %p169_p13 = scmp.lt.s32.totalorder %s2454_s23, 3  ;;  %s3336_s1 = sld [smem:[#allocation13_spill]] }
  0x2d   : > { %s2458_s17 = smov [#allocation3]   ;;  %s1964_s19 = sshll.u32 %s2454_s23, 3 }
  0x2e   : > { %p2598_p1 = pnand %p1942_p9, %p169_p13  ;;  %s185_s18 = sshll.u32 %s2458_s17, 4  ;;  %s186_s18 = int_to_ptr.vmem [resolvable:$true] %s185_s18 }
  0x2f   : > { %s233_s29 = scalar_lea.hbm %s3325_s4, %s1964_s19  ;;  %s2459_s11 = smov 128  }
  0x30   : > { %p2072_p0 = pneg %p2598_p1  ;;  %s234_s7 = sshll.u32 %s233_s29, 4  ;;  %s235_s7 = int_to_ptr.hbm [resolvable:$true] %s234_s7 }
  0x31   : > { %s2460_s13 = smov 8   ;;  %s2354_s27 = sshra.s32 %s235_s7, 4  ;;  %s2355_s27 = int_to_ptr.hbm [resolvable:$true] %s2354_s27 }
  0x32   : > { %s183_s15 = sshll.u32 %s3336_s1, 4  ;;  %p2073_p2 = pnand %p2072_p0, %p107_p4  ;;  %s184_s15 = int_to_ptr.hbm [resolvable:$true] %s183_s15 }
  0x33   : > { %s2356_s28 = scalar_lea.hbm %s2355_s27, 8  ;;  %s2361_s3 = scalar_lea.hbm %s3325_s4, 16 }
  0x34   : > { %2075 = dma.hbm_to_vmem [thread:$0]  (!%p2073_p2), %s184_s15, 640, %s186_s18, [#allocation4], %s2459_s11, %s2459_s11, %s2460_s13  }
  0x35   : > { %p2357_p5 = scmp.ne.s32.totalorder %s2355_s27, %s2356_s28  ;;  %p2362_p13 = scmp.lt.s32.totalorder %s2355_s27, %s3325_s4 }
  0x36   : > { %p2363_p0 = scmp.lt.s32.totalorder %s2361_s3, %s2356_s28 }
  0x37   : > { %p2359_p7 = pnand %p2357_p5, %p2298_p8 }
  0x38   : > { %p2364_p3 = por %p2363_p0, %p2362_p13 }
  0x39   : > { %p2360_p9 = pneg %p2359_p7 }
  0x3b   : > { %p2365_p2 = pnand %p2364_p3, %p2360_p9 }
  0x3d   : > { %2368 = shalt.err (!%p2365_p2)
}
  0x3e   : > { %s3338_s15 = smov 4   ;;  %s3339_s18 = smov 64  }
  0x3f   : > { %2082 = dma.hbm_to_vmem [thread:$0]  (!%p2543_p6), %s235_s7, 128, %s237_s30, %s2547_s14, %s3339_s18, %s3339_s18, %s3338_s15  }
  0x40   : > { %248 = sbr.rel (%p2598_p1) target bundleno = 2098 (0x832), region = 40 }
  0x45   : > { %2429 = dma.done.wait (%p107_p4), [#allocation4], 640  }
  0x46   : > { %2431 = vsyncadd (%p107_p4), [#allocation4], 4294966656  ;;  %s255_s1 = sand.u32 1, %s2569_s6   ;;  %s2634_s3 = sand.u32 1, %s2446_s21  }
  0x47   : > { %s1953_s12 = sshll.u32 %s2634_s3, 5  ;;  %s256_s27 = scalar_lea.sflag [#allocation7], %s255_s1 }
  0x48   : > { %s2637_s28 = scalar_lea.vmem [#allocation6], %s1953_s12 }
  0x49   : > { %2433 = dma.done.wait (%p2579_p10), %s256_s27, 640  }
  0x4a   : > { %2435 = vsyncadd (%p2579_p10), %s256_s27, 4294966656  ;;  %s1954_s14 = sshll.u32 %s2634_s3, 3  ;;  %s305_s30 = sld [smem:[#allocation2]]  ;;  %v1970_v0 = vld [vmem:[%s2637_s28] sm:$0xff]   ;;  %v1985_v1 = vld [vmem:[%s2637_s28 + $0x8] sm:$0xff]   ;;  %vm385_vm0 = vcmask 1041408  }
  0x4b   : > { %s269_s16 = scalar_lea.vmem [#allocation8], %s1954_s14  ;;  %v2646_v3 = vunpack.c.h.bf16 %v1970_v0  ;;  %v2648_v4 = vunpack.c.l.bf16 %v1985_v1  ;;  %v2650_v5 = vunpack.c.l.bf16 %v1970_v0  ;;  %s2461_s8 = smov 1   ;;  %vm313_vm1 = vcmask 130048   ;;  %v1986_v29 = vld [vmem:[%s2637_s28 + $0x10] sm:$0xff]   ;;  %v1987_v37 = vld [vmem:[%s2637_s28 + $0x18] sm:$0xff]  }
  0x4c   : > { %v1966_v2 = vld [vmem:[%s269_s16] sm:$0xff]   ;;  %s2462_s25 = smov 2   ;;  %v2672_v21 = vunpack.c.h.bf16 %v1985_v1  ;;  %vm330_vm2 = vcmask 1040384   ;;  %v2688_v31 = vunpack.c.l.bf16 %v1986_v29  ;;  %v2690_v32 = vunpack.c.h.bf16 %v1986_v29  ;;  %s2463_s29 = smov 126  }
  0x4d   : > { %v1967_v6 = vunpack.c.l.bf16 %v1966_v2  ;;  %v1968_v7 = vunpack.c.h.bf16 %v1966_v2  ;;  %v2653_v8 = vrot.slane %v2646_v3, 6  ;;  %v2656_v9 = vrot.slane %v2648_v4, 6  ;;  %s2464_s7 = smov 127  }
  0x4e   : > { %v2659_v10 = vrot.slane %v2650_v5, 6  ;;  %v2678_v28 = vrot.slane %v2672_v21, 6  ;;  %v2696_v35 = vrot.slane %v2688_v31, 6  ;;  %v2699_v36 = vrot.slane %v2690_v32, 6 }
  0x4f   : > { %v306_v12 = vsub.f32 1.0, %v1967_v6  ;;  %v307_v13 = vsub.f32 1.0, %v1968_v7  ;;  %v2167_v14 = vpack.i.bf16 %v2656_v9, %v2653_v8  ;;  %v2704_v38 = vunpack.c.l.bf16 %v1987_v37 }
  0x50   : > { %v308_v11 = vstv %s305_s30  ;;  %v2666_v15 = vsel %vm385_vm0, %v2659_v10, %v2653_v8  ;;  %v2686_v30 = vsel %vm385_vm0, %v2656_v9, %v2678_v28  ;;  %v2706_v39 = vunpack.c.h.bf16 %v1987_v37 }
  0x51   : > { %v2132_v16 = vpack.i.bf16 %v2666_v15, %v2659_v10  ;;  %v309_v17 = vmul.f32 %v308_v11, %v306_v12  ;;  %v310_v18 = vmul.f32 %v308_v11, %v307_v13  ;;  %2168 = vrot.lane.b32.xlu1 %v2167_v14, %s2461_s8  ;;  %v2142_v34 = vpack.i.bf16 %v2678_v28, %v2686_v30 }
  0x52   : > { %v2711_v40 = vsel %vm385_vm0, %v2696_v35, %v2699_v36  ;;  %v2716_v42 = vrot.slane %v2704_v38, 6  ;;  %v2719_v43 = vrot.slane %v2706_v39, 6  ;;  %v2735_v48 = vrot.slane %v2650_v5, 7 }
  0x53   : > { %2133 = vrot.lane.b32.xlu2 %v2132_v16, %s2462_s25  ;;  %v311_v19 = vadd.f32 %v1967_v6, %v309_v17  ;;  %v312_v20 = vadd.f32 %v1968_v7, %v310_v18  ;;  %v2147_v41 = vpack.i.bf16 %v2711_v40, %v2696_v35  ;;  %v2738_v49 = vrot.slane %v2646_v3, 7 }
  0x54   : > { %v2727_v45 = vsel %vm385_vm0, %v2716_v42, %v2719_v43  ;;  %v2152_v47 = vpack.i.bf16 %v2716_v42, %v2699_v36  ;;  %vm349_vm3 = vcmask 7168   ;;  %vm353_vm4 = vcmask 138240  }
  0x55   : > { %v314_v22 = vsel %vm313_vm1, %v311_v19, 0.0  ;;  %v315_v23 = vsel %vm313_vm1, %v312_v20, 0.0  ;;  %v331_v24 = vrot.slane %v311_v19, 7  ;;  %v332_v25 = vrot.slane %v312_v20, 7 }
  0x56   : > { %v316_v26 = vadd.f32 %v315_v23, %v314_v22  ;;  %v2187_v46 = vpack.i.bf16 %v2719_v43, %v2727_v45  ;;  %v2746_v50 = vsel %vm330_vm2, %v2735_v48, %v2738_v49  ;;  %vm404_vm5 = vcmask 1045504  }
  0x57   : > { %v333_v27 = vsel %vm330_vm2, %v331_v24, %v332_v25  ;;  %v337_v33 = vsel %vm330_vm2, %v332_v25, 0.0  ;;  %v336_v44 = vsel %vm330_vm2, 0.0, %v331_v24  ;;  %v2750_v51 = vpack.i.bf16 %v2746_v50, %v2735_v48 }
  0x58   : > { %317 = vadd.xlane.f32.xlu0 %v316_v26  ;;  %vm937_vm6 = vcmask 1046528  }
  0x59   : > { %342 = vrot.lane.b32.xlu1 %v333_v27, %s2461_s8 }
  0x5b   : > { %2138 = vrot.lane.b32.xlu2 %v2167_v14, %s2462_s25 }
  0x61   : > { %344 = vrot.lane.b32.xlu1 %v337_v33, %s2461_s8 }
  0x63   : > { %2143 = vrot.lane.b32.xlu2 %v2142_v34, %s2462_s25 }
  0x69   : > { %2173 = vrot.lane.b32.xlu1 %v2142_v34, %s2461_s8 }
  0x6b   : > { %2148 = vrot.lane.b32.xlu2 %v2147_v41, %s2462_s25 }
  0x6c   : > { %340 = vrot.lane.b32.xlu0 %v336_v44, %s2461_s8 }
  0x71   : > { %2188 = vrot.lane.b32.xlu1 %v2187_v46, %s2461_s8 }
  0x73   : > { %2153 = vrot.lane.b32.xlu2 %v2152_v47, %s2462_s25 }
  0x74   : > { %2163 = vrot.lane.b32.xlu0 %v2132_v16, %s2461_s8 }
  0x7b   : > { %2158 = vrot.lane.b32.xlu2 %v2187_v46, %s2462_s25 }
  0x7c   : > { %2193 = vrot.lane.b32.xlu0 %v2750_v51, %s2462_s25 }
  0x83   : > { %2178 = vrot.lane.b32.xlu2 %v2147_v41, %s2461_s8 }
  0x8b   : > { %2183 = vrot.lane.b32.xlu2 %v2152_v47, %s2461_s8 }
  0xad   : > { %v2134_v52 = vpop.permute.xlu2 %2133 }
  0xae   : > { %v2136_v1 = vunpack.i.h.bf16 %v2134_v52  ;;  %v2135_v26 = vunpack.i.l.bf16 %v2134_v52 }
  0xb5   : > { %v2139_v53 = vpop.permute.xlu2 %2138 }
  0xb6   : > { %v2140_v11 = vunpack.i.l.bf16 %v2139_v53  ;;  %v2141_v33 = vunpack.i.h.bf16 %v2139_v53 }
  0xbd   : > { %v2144_v54 = vpop.permute.xlu2 %2143 }
  0xbe   : > { %v2146_v17 = vunpack.i.h.bf16 %v2144_v54  ;;  %v2145_v19 = vunpack.i.l.bf16 %v2144_v54 }
  0xc3   : > { %v2757_v55 = vpop.permute.xlu1 %2168 }
  0xc5   : > { %v2149_v56 = vpop.permute.xlu2 %2148 }
  0xc6   : > { %v2150_v34 = vunpack.i.l.bf16 %v2149_v56  ;;  %v2151_v44 = vunpack.i.h.bf16 %v2149_v56 }
  0xcb   : > { %v318_v57 = vpop.xlane.xlu0 %317  ;;  %v343_v59 = vpop.permute.xlu1 %342 }
  0xcc   : > { %v319_v58 = vrot.slane %v318_v57, 4  ;;  %v351_v61 = vsel %vm349_vm3, 0.0, %v343_v59 }
  0xcd   : > { %v2761_v63 = vsel %vm353_vm4, %v351_v61, 0.0  ;;  %v2154_v2 = vpop.permute.xlu2 %2153 }
  0xce   : > { %v320_v60 = vadd.f32 %v319_v58, %v318_v57  ;;  %v399_v12 = vmul.f32 %v2136_v1, %v2761_v63  ;;  %v447_v25 = vmul.f32 %v2145_v19, %v2761_v63 }
  0xd0   : > { %v321_v62 = vrot.slane %v320_v60, 2  ;;  %v406_v20 = vrot.slane %v399_v12, 2  ;;  %v453_v46 = vrot.slane %v447_v25, 2 }
  0xd2   : > { %v322_v0 = vadd.f32 %v321_v62, %v320_v60  ;;  %v2156_v60 = vunpack.i.h.bf16 %v2154_v2 }
  0xd3   : > { %v345_v6 = vpop.permute.xlu1 %344 }
  0xd4   : > { %v323_v7 = vrot.slane %v322_v0, 1  ;;  %v352_v13 = vsel %vm349_vm3, 0.0, %v345_v6 }
  0xd5   : > { %v2766_v14 = vsel %vm353_vm4, %v352_v13, 0.0  ;;  %v2159_v27 = vpop.permute.xlu2 %2158  ;;  %v2155_v13 = vunpack.i.l.bf16 %v2154_v2 }
  0xd6   : > { %v324_v16 = vadd.f32 %v323_v7, %v322_v0  ;;  %v400_v18 = vmul.f32 %v2140_v11, %v2766_v14  ;;  %v448_v24 = vmul.f32 %v2146_v17, %v2766_v14  ;;  %v2161_v54 = vunpack.i.h.bf16 %v2159_v27 }
  0xd7   : > { %v2160_v57 = vunpack.i.l.bf16 %v2159_v27  ;;  %v499_v0 = vmul.f32 %v2151_v44, %v2761_v63  ;;  %v500_v27 = vmul.f32 %v2155_v13, %v2766_v14 }
  0xd8   : > { %1988 = vpush %v324_v16  ;;  %v408_v22 = vrot.slane %v400_v18, 2  ;;  %v455_v41 = vrot.slane %v448_v24, 2  ;;  %v552_v1 = vmul.f32 %v2161_v54, %v2766_v14 }
  0xd9   : > { %v551_v56 = vmul.f32 %v2160_v57, %v2761_v63  ;;  %v505_v17 = vrot.slane %v499_v0, 2  ;;  %v507_v44 = vrot.slane %v500_v27, 2 }
  0xda   : > { %v409_v23 = vsel %vm404_vm5, %v406_v20, %v408_v22  ;;  %v456_v53 = vsel %vm404_vm5, %v453_v46, %v455_v41  ;;  %v559_v19 = vrot.slane %v552_v1, 2 }
  0xdb   : > { %412 = vrot.lane.b32.xlu2 %v409_v23, %s2463_s29  ;;  %v557_v18 = vrot.slane %v551_v56, 2 }
  0xdd   : > { %v2179_v24 = vpop.permute.xlu2 %2178 }
  0xde   : > { %v341_v29 = vpop.permute.xlu0 %340  ;;  %v2181_v57 = vunpack.i.h.bf16 %v2179_v24 }
  0xdf   : > { %v350_v37 = vsel %vm349_vm3, 0.0, %v341_v29  ;;  %v2174_v29 = vpop.permute.xlu1 %2173 }
  0xe0   : > { %v2775_v47 = vsel %vm353_vm4, %v350_v37, 0.0  ;;  %v2175_v41 = vunpack.i.l.bf16 %v2174_v29  ;;  %v692_v1 = vmul.f32 %v2181_v57, %v2761_v63 }
  0xe1   : > { %v398_v58 = vmul.f32 %v2135_v26, %v2775_v47  ;;  %v446_v59 = vmul.f32 %v2141_v33, %v2775_v47  ;;  %v498_v52 = vmul.f32 %v2150_v34, %v2775_v47  ;;  %v550_v7 = vmul.f32 %v2156_v60, %v2775_v47 }
  0xe2   : > { %v560_v33 = vsel %vm404_vm5, %v557_v18, %v559_v19  ;;  %v2170_v34 = vunpack.i.l.bf16 %v2757_v55 }
  0xe3   : > { %v405_v61 = vrot.slane %v398_v58, 2  ;;  %v452_v62 = vrot.slane %v446_v59, 2  ;;  %459 = vrot.lane.b32.xlu2 %v456_v53, %s2463_s29  ;;  %v504_v16 = vrot.slane %v498_v52, 2  ;;  %v556_v25 = vrot.slane %v550_v7, 2 }
  0xe4   : > { %v599_v54 = vmul.f32 %v2170_v34, %v2766_v14  ;;  %v2180_v58 = vunpack.i.l.bf16 %v2179_v24  ;;  %v2176_v52 = vunpack.i.h.bf16 %v2174_v29  ;;  %v645_v53 = vmul.f32 %v2175_v41, %v2761_v63 }
  0xe5   : > { %v454_v6 = vsel %vm404_vm5, %v452_v62, %v453_v46  ;;  %v407_v11 = vsel %vm404_vm5, %v405_v61, %v406_v20  ;;  %v506_v26 = vsel %vm404_vm5, %v504_v16, %v505_v17  ;;  %v558_v37 = vsel %vm404_vm5, %v556_v25, %v557_v18  ;;  %v2184_v0 = vpop.permute.xlu2 %2183 }
  0xe6   : > { %457 = vrot.lane.b32.xlu0 %v454_v6, %s2463_s29  ;;  %v2164_v12 = vpop.permute.xlu0 %2163  ;;  %410 = vrot.lane.b32.xlu1 %v407_v11, %s2463_s29  ;;  %v2171_v46 = vunpack.i.h.bf16 %v2757_v55  ;;  %v508_v62 = vsel %vm404_vm5, %v505_v17, %v507_v44  ;;  %v606_v56 = vrot.slane %v599_v54, 2  ;;  %v691_v55 = vmul.f32 %v2180_v58, %v2775_v47 }
  0xe7   : > { %v2166_v22 = vunpack.i.h.bf16 %v2164_v12  ;;  %v2165_v23 = vunpack.i.l.bf16 %v2164_v12  ;;  %v646_v7 = vmul.f32 %v2176_v52, %v2766_v14  ;;  %v2189_v11 = vpop.permute.xlu1 %2188  ;;  %v651_v13 = vrot.slane %v645_v53, 2 }
  0xe8   : > { %v644_v61 = vmul.f32 %v2171_v46, %v2775_v47  ;;  %v2185_v17 = vunpack.i.l.bf16 %v2184_v0  ;;  %v698_v18 = vrot.slane %v692_v1, 2  ;;  %v697_v19 = vrot.slane %v691_v55, 2 }
  0xe9   : > { %v598_v20 = vmul.f32 %v2166_v22, %v2761_v63  ;;  %v597_v2 = vmul.f32 %v2165_v23, %v2775_v47  ;;  %v2190_v22 = vunpack.i.l.bf16 %v2189_v11  ;;  %v2186_v23 = vunpack.i.h.bf16 %v2184_v0 }
  0xea   : > { %v650_v16 = vrot.slane %v644_v61, 2  ;;  %v653_v24 = vrot.slane %v646_v7, 2  ;;  %v693_v25 = vmul.f32 %v2185_v17, %v2766_v14  ;;  %v2191_v34 = vunpack.i.h.bf16 %v2189_v11 }
  0xeb   : > { %509 = vrot.lane.b32.xlu2 %v506_v26, %s2463_s29  ;;  %v604_v59 = vrot.slane %v598_v20, 2  ;;  %v603_v60 = vrot.slane %v597_v2, 2  ;;  %v739_v27 = vmul.f32 %v2190_v22, %v2761_v63  ;;  %v738_v29 = vmul.f32 %v2186_v23, %v2775_v47 }
  0xec   : > { %v652_v26 = vsel %vm404_vm5, %v650_v16, %v651_v13  ;;  %v699_v20 = vsel %vm404_vm5, %v697_v19, %v698_v18  ;;  %v654_v2 = vsel %vm404_vm5, %v651_v13, %v653_v24  ;;  %v740_v46 = vmul.f32 %v2191_v34, %v2766_v14 }
  0xed   : > { %v605_v6 = vsel %vm404_vm5, %v603_v60, %v604_v59  ;;  %v607_v12 = vsel %vm404_vm5, %v604_v59, %v606_v56  ;;  %v744_v41 = vrot.slane %v738_v29, 2  ;;  %v779_v59 = vmul.f32 %v2659_v10, %v2775_v47 }
  0xee   : > { %563 = vrot.lane.b32.xlu0 %v560_v33, %s2463_s29  ;;  %561 = vrot.lane.b32.xlu1 %v558_v37, %s2463_s29  ;;  %v700_v33 = vrot.slane %v693_v25, 2  ;;  %v745_v37 = vrot.slane %v739_v27, 2  ;;  %v747_v57 = vrot.slane %v740_v46, 2  ;;  %v780_v60 = vmul.f32 %v2666_v15, %v2761_v63 }
  0xef   : > { %v781_v52 = vmul.f32 %v2653_v8, %v2766_v14  ;;  %v785_v53 = vrot.slane %v779_v59, 2  ;;  %v811_v61 = vmul.f32 %v2656_v9, %v2775_v47  ;;  %v812_v56 = vmul.f32 %v2686_v30, %v2761_v63 }
  0xf0   : > { %v701_v44 = vsel %vm404_vm5, %v698_v18, %v700_v33  ;;  %v746_v54 = vsel %vm404_vm5, %v744_v41, %v745_v37  ;;  %v748_v58 = vsel %vm404_vm5, %v745_v37, %v747_v57  ;;  %v813_v1 = vmul.f32 %v2678_v28, %v2766_v14 }
  0xf1   : > { %v788_v0 = vrot.slane %v781_v52, 2  ;;  %v817_v55 = vrot.slane %v811_v61, 2  ;;  %v848_v9 = vmul.f32 %v2696_v35, %v2775_v47  ;;  %v849_v28 = vmul.f32 %v2711_v40, %v2761_v63 }
  0xf2   : > { %v820_v7 = vrot.slane %v813_v1, 2  ;;  %v850_v16 = vmul.f32 %v2699_v36, %v2766_v14  ;;  %v885_v25 = vmul.f32 %v2716_v42, %v2775_v47  ;;  %v886_v36 = vmul.f32 %v2727_v45, %v2761_v63 }
  0xf3   : > { %511 = vrot.lane.b32.xlu2 %v508_v62, %s2463_s29  ;;  %v786_v62 = vrot.slane %v780_v60, 2  ;;  %v854_v18 = vrot.slane %v848_v9, 2  ;;  %v855_v23 = vrot.slane %v849_v28, 2  ;;  %v2874_v61 = vrot.slane %v2648_v4, 7 }
  0xf4   : > { %v857_v35 = vrot.slane %v850_v16, 2  ;;  %v891_v29 = vrot.slane %v885_v25, 2  ;;  %v892_v34 = vrot.slane %v886_v36, 2 }
  0xf5   : > { %v787_v10 = vsel %vm404_vm5, %v785_v53, %v786_v62  ;;  %v789_v15 = vsel %vm404_vm5, %v786_v62, %v788_v0  ;;  %v856_v24 = vsel %vm404_vm5, %v854_v18, %v855_v23  ;;  %v2878_v62 = vpack.i.bf16 %v2874_v61, %v2738_v49 }
  0xf6   : > { %608 = vrot.lane.b32.xlu0 %v605_v6, %s2464_s7  ;;  %610 = vrot.lane.b32.xlu1 %v607_v12, %s2464_s7  ;;  %v818_v6 = vrot.slane %v812_v56, 2  ;;  %v792_v8 = vsel %vm313_vm1, %v787_v10, 0.0  ;;  %v793_v12 = vsel %vm313_vm1, %v789_v15, 0.0  ;;  %v858_v40 = vsel %vm404_vm5, %v855_v23, %v857_v35 }
  0xf7   : > { %v794_v30 = vadd.f32 %v793_v12, %v792_v8  ;;  %v861_v27 = vsel %vm313_vm1, %v856_v24, 0.0  ;;  %v893_v42 = vsel %vm404_vm5, %v891_v29, %v892_v34 }
  0xf8   : > { %v819_v11 = vsel %vm404_vm5, %v817_v55, %v818_v6  ;;  %v821_v13 = vsel %vm404_vm5, %v818_v6, %v820_v7  ;;  %v898_v45 = vsel %vm313_vm1, %v893_v42, 0.0 }
  0xf9   : > { %v824_v17 = vsel %vm313_vm1, %v819_v11, 0.0  ;;  %v825_v19 = vsel %vm313_vm1, %v821_v13, 0.0 }
  0xfa   : > { %v826_v22 = vadd.f32 %v825_v19, %v824_v17 }
  0xfb   : > { %655 = vrot.lane.b32.xlu2 %v652_v26, %s2464_s7  ;;  %v887_v26 = vmul.f32 %v2719_v43, %v2766_v14 }
  0xfd   : > { %v894_v37 = vrot.slane %v887_v26, 2 }
  0xfe   : > { %702 = vrot.lane.b32.xlu0 %v699_v20, %s2464_s7  ;;  %657 = vrot.lane.b32.xlu1 %v654_v2, %s2464_s7  ;;  %v2194_v20 = vpop.permute.xlu0 %2193  ;;  %v862_v2 = vsel %vm313_vm1, %v858_v40, 0.0 }
  0xff   : > { %v863_v33 = vadd.f32 %v862_v2, %v861_v27  ;;  %v2196_v41 = vunpack.i.h.bf16 %v2194_v20  ;;  %v895_v46 = vsel %vm404_vm5, %v892_v34, %v894_v37 }
 0x100   : > { %v899_v57 = vsel %vm313_vm1, %v895_v46, 0.0 }
 0x101   : > { %v932_v43 = vmul.f32 %v2196_v41, %v2761_v63 }
 0x103   : > { %704 = vrot.lane.b32.xlu2 %v701_v44, %s2464_s7  ;;  %v2195_v44 = vunpack.i.l.bf16 %v2194_v20  ;;  %v939_v59 = vrot.slane %v932_v43, 1 }
 0x106   : > { %749 = vrot.lane.b32.xlu0 %v746_v54, %s2464_s7  ;;  %v931_v54 = vmul.f32 %v2195_v44, %v2775_v47 }
 0x108   : > { %v938_v60 = vrot.slane %v931_v54, 1 }
 0x109   : > { %s2966_s11 = spop %1988 }
 0x10a   : > { %v940_v52 = vsel %vm937_vm6, %v938_v60, %v939_v59 }
 0x10e   : > { %751 = vrot.lane.b32.xlu0 %v748_v58, %s2464_s7  ;;  %v900_v58 = vadd.f32 %v899_v57, %v898_v45 }
 0x128   : > { %795 = vadd.xlane.f32.xlu1 %v794_v30 }
 0x12c   : > { %827 = vadd.xlane.f32.xlu2 %v826_v22 }
 0x134   : > { %864 = vadd.xlane.f32.xlu2 %v863_v33 }
 0x135   : > { %v413_v53 = vpop.permute.xlu2 %412 }
 0x136   : > { %v417_v12 = vsel %vm313_vm1, %v413_v53, 0.0 }
 0x13c   : > { %901 = vadd.xlane.f32.xlu2 %v900_v58 }
 0x13d   : > { %v460_v0 = vpop.permute.xlu2 %459 }
 0x13e   : > { %v464_v1 = vsel %vm313_vm1, %v460_v0, 0.0 }
 0x141   : > { %943 = vrot.lane.b32.xlu1 %v940_v52, %s2463_s29 }
 0x145   : > { %v510_v8 = vpop.permute.xlu2 %509 }
 0x146   : > { %v515_v22 = vsel %vm313_vm1, %v510_v8, 0.0 }
 0x14d   : > { %v512_v18 = vpop.permute.xlu2 %511 }
 0x14e   : > { %v516_v19 = vsel %vm313_vm1, %v512_v18, 0.0 }
 0x14f   : > { %v517_v23 = vadd.f32 %v516_v19, %v515_v22 }
 0x154   : > { %2198 = vrot.lane.b32.xlu2 %v2878_v62, %s2462_s25 }
 0x155   : > { %v656_v24 = vpop.permute.xlu2 %655 }
 0x156   : > { %v661_v40 = vsel %vm313_vm1, %v656_v24, 0.0 }
 0x158   : > { %v458_v56 = vpop.permute.xlu0 %457  ;;  %v411_v10 = vpop.permute.xlu1 %410 }
 0x159   : > { %v463_v55 = vsel %vm313_vm1, %v458_v56, 0.0  ;;  %v416_v11 = vsel %vm313_vm1, %v411_v10, 0.0 }
 0x15a   : > { %v465_v15 = vadd.f32 %v464_v1, %v463_v55  ;;  %v418_v16 = vadd.f32 %v417_v12, %v416_v11 }
 0x15d   : > { %v705_v2 = vpop.permute.xlu2 %704 }
 0x15e   : > { %v709_v34 = vsel %vm313_vm1, %v705_v2, 0.0 }
 0x160   : > { %v564_v6 = vpop.permute.xlu0 %563  ;;  %v562_v7 = vpop.permute.xlu1 %561 }
 0x161   : > { %v567_v36 = vsel %vm313_vm1, %v562_v7, 0.0  ;;  %v568_v26 = vsel %vm313_vm1, %v564_v6, 0.0 }
 0x162   : > { %v569_v29 = vadd.f32 %v568_v26, %v567_v36 }
 0x168   : > { %v609_v9 = vpop.permute.xlu0 %608  ;;  %v611_v30 = vpop.permute.xlu1 %610 }
 0x169   : > { %v614_v13 = vsel %vm313_vm1, %v609_v9, 0.0  ;;  %v615_v28 = vsel %vm313_vm1, %v611_v30, 0.0  ;;  %v2911_v9 = vrot.slane %v2672_v21, 7 }
 0x16a   : > { %v616_v17 = vadd.f32 %v615_v28, %v614_v13 }
 0x16b   : > { %419 = vadd.xlane.f32.xlu1 %v418_v16  ;;  %v2916_v12 = vsel %vm330_vm2, %v2874_v61, %v2911_v9 }
 0x170   : > { %v658_v35 = vpop.permute.xlu1 %657  ;;  %v703_v20 = vpop.permute.xlu0 %702 }
 0x171   : > { %v662_v25 = vsel %vm313_vm1, %v658_v35, 0.0  ;;  %v708_v33 = vsel %vm313_vm1, %v703_v20, 0.0 }
 0x172   : > { %v663_v27 = vadd.f32 %v662_v25, %v661_v40  ;;  %v710_v37 = vadd.f32 %v709_v34, %v708_v33 }
 0x173   : > { %518 = vadd.xlane.f32.xlu1 %v517_v23 }
 0x178   : > { %v750_v10 = vpop.permute.xlu0 %749 }
 0x17b   : > { %664 = vadd.xlane.f32.xlu1 %v663_v27 }
 0x17d   : > { %570 = vadd.xlane.f32.xlu2 %v569_v29 }
 0x180   : > { %v752_v7 = vpop.permute.xlu0 %751 }
 0x181   : > { %v756_v8 = vsel %vm313_vm1, %v752_v7, 0.0 }
 0x185   : > { %711 = vadd.xlane.f32.xlu2 %v710_v37 }
 0x19b   : > { %v796_v58 = vpop.xlane.xlu1 %795 }
 0x19f   : > { %v2896_v41 = vpop.xlane.xlu2 %827 }
 0x1a7   : > { %v2898_v44 = vpop.xlane.xlu2 %864 }
 0x1af   : > { %v2900_v42 = vpop.xlane.xlu2 %901 }
 0x1b0   : > { %v903_v7 = vrot.slane %v2900_v42, 4 }
 0x1b3   : > { %v944_v60 = vpop.permute.xlu1 %943 }
 0x1b4   : > { %v949_v13 = vsel %vm313_vm1, %v944_v60, 0.0  ;;  %v829_v60 = vrot.slane %v2896_v41, 4 }
 0x1b7   : > { %v2902_v46 = vpop.permute.xlu2 %2198 }
 0x1b8   : > { %v2200_v45 = vunpack.i.l.bf16 %v2902_v46 }
 0x1ba   : > { %v933_v43 = vmul.f32 %v2200_v45, %v2766_v14 }
 0x1bc   : > { %v941_v54 = vrot.slane %v933_v43, 1 }
 0x1be   : > { %v942_v57 = vsel %vm937_vm6, %v939_v59, %v941_v54  ;;  %v755_v59 = vsel %vm313_vm1, %v750_v10, 0.0 }
 0x1bf   : > { %945 = vrot.lane.b32.xlu0 %v942_v57, %s2463_s29  ;;  %v757_v11 = vadd.f32 %v756_v8, %v755_v59  ;;  %v797_v57 = vrot.slane %v796_v58, 4 }
 0x1de   : > { %v420_v52 = vpop.xlane.xlu1 %419 }
 0x1df   : > { %v421_v53 = vrot.slane %v420_v52, 4 }
 0x1e1   : > { %v422_v0 = vadd.f32 %v421_v53, %v420_v52 }
 0x1e3   : > { %v423_v56 = vrot.slane %v422_v0, 2 }
 0x1e5   : > { %v424_v1 = vadd.f32 %v423_v56, %v422_v0 }
 0x1e7   : > { %v425_v55 = vrot.slane %v424_v1, 1 }
 0x1e9   : > { %v426_v6 = vadd.f32 %v425_v55, %v424_v1  ;;  %466 = vadd.xlane.f32.xlu0 %v465_v15  ;;  %v2920_v15 = vpack.i.bf16 %v2911_v9, %v2916_v12 }
 0x1eb   : > { %1990 = vpush %v426_v6  ;;  %v866_v6 = vrot.slane %v2898_v44, 4 }
 0x1f0   : > { %v571_v18 = vpop.xlane.xlu2 %570 }
 0x1f1   : > { %617 = vadd.xlane.f32.xlu0 %v616_v17  ;;  %v519_v17 = vpop.xlane.xlu1 %518  ;;  %v572_v22 = vrot.slane %v571_v18, 4 }
 0x1f2   : > { %v520_v19 = vrot.slane %v519_v17, 4 }
 0x1f3   : > { %v573_v24 = vadd.f32 %v572_v22, %v571_v18  ;;  %v904_v22 = vadd.f32 %v903_v7, %v2900_v42 }
 0x1f4   : > { %v521_v23 = vadd.f32 %v520_v19, %v519_v17  ;;  %v867_v19 = vadd.f32 %v866_v6, %v2898_v44  ;;  %v2201_v6 = vunpack.i.h.bf16 %v2902_v46  ;;  %v2939_v46 = vrot.slane %v2688_v31, 7 }
 0x1f5   : > { %v574_v27 = vrot.slane %v573_v24, 2 }
 0x1f6   : > { %v522_v40 = vrot.slane %v521_v23, 2 }
 0x1f7   : > { %v575_v43 = vadd.f32 %v574_v27, %v573_v24  ;;  %v868_v27 = vrot.slane %v867_v19, 2 }
 0x1f8   : > { %v712_v25 = vpop.xlane.xlu2 %711  ;;  %v523_v34 = vadd.f32 %v522_v40, %v521_v23 }
 0x1f9   : > { %758 = vadd.xlane.f32.xlu0 %v757_v11  ;;  %v665_v35 = vpop.xlane.xlu1 %664  ;;  %v713_v29 = vrot.slane %v712_v25, 4  ;;  %v576_v55 = vrot.slane %v575_v43, 1  ;;  %v798_v11 = vadd.f32 %v797_v57, %v796_v58  ;;  %v869_v42 = vadd.f32 %v868_v27, %v867_v19 }
 0x1fa   : > { %v666_v36 = vrot.slane %v665_v35, 4  ;;  %v524_v0 = vrot.slane %v523_v34, 1 }
 0x1fb   : > { %v714_v37 = vadd.f32 %v713_v29, %v712_v25  ;;  %v577_v17 = vadd.f32 %v576_v55, %v575_v43 }
 0x1fc   : > { %v667_v33 = vadd.f32 %v666_v36, %v665_v35  ;;  %v799_v35 = vrot.slane %v798_v11, 2 }
 0x1fd   : > { %v715_v56 = vrot.slane %v714_v37, 2 }
 0x1fe   : > { %v668_v52 = vrot.slane %v667_v33, 2 }
 0x1ff   : > { %v716_v18 = vadd.f32 %v715_v56, %v714_v37 }
 0x20d   : > { %2203 = vrot.lane.b32.xlu0 %v2920_v15, %s2462_s25 }
 0x21c   : > { %s2968_s13 = spop %1990 }
 0x231   : > { %v946_v30 = vpop.permute.xlu0 %945 }
 0x232   : > { %v950_v28 = vsel %vm313_vm1, %v946_v30, 0.0  ;;  %v525_v30 = vadd.f32 %v524_v0, %v523_v34 }
 0x233   : > { %v951_v16 = vadd.f32 %v950_v28, %v949_v13  ;;  %v669_v13 = vadd.f32 %v668_v52, %v667_v33  ;;  %v830_v28 = vadd.f32 %v829_v60, %v2896_v41  ;;  %v905_v41 = vrot.slane %v904_v22, 2 }
 0x234   : > { %v800_v33 = vadd.f32 %v799_v35, %v798_v11  ;;  %v870_v52 = vrot.slane %v869_v42, 1 }
 0x235   : > { %952 = vadd.xlane.f32.xlu2 %v951_v16  ;;  %v670_v25 = vrot.slane %v669_v13, 1  ;;  %v831_v40 = vrot.slane %v830_v28, 2  ;;  %v906_v43 = vadd.f32 %v905_v41, %v904_v22  ;;  %v2942_v22 = vrot.slane %v2690_v32, 7 }
 0x237   : > { %v832_v37 = vadd.f32 %v831_v40, %v830_v28  ;;  %v907_v0 = vrot.slane %v906_v43, 1 }
 0x239   : > { %v833_v60 = vrot.slane %v832_v37, 1  ;;  %v908_v55 = vadd.f32 %v907_v0, %v906_v43 }
 0x25c   : > { %v467_v26 = vpop.xlane.xlu0 %466 }
 0x25d   : > { %v468_v20 = vrot.slane %v467_v26, 4 }
 0x25f   : > { %v469_v2 = vadd.f32 %v468_v20, %v467_v26  ;;  %v717_v26 = vrot.slane %v716_v18, 1 }
 0x261   : > { %v470_v45 = vrot.slane %v469_v2, 2  ;;  %v718_v44 = vadd.f32 %v717_v26, %v716_v18 }
 0x263   : > { %v471_v54 = vadd.f32 %v470_v45, %v469_v2  ;;  %v671_v2 = vadd.f32 %v670_v25, %v669_v13 }
 0x264   : > { %v618_v53 = vpop.xlane.xlu0 %617 }
 0x265   : > { %v619_v1 = vrot.slane %v618_v53, 4  ;;  %v472_v10 = vrot.slane %v471_v54, 1 }
 0x267   : > { %v620_v8 = vadd.f32 %v619_v1, %v618_v53  ;;  %v473_v59 = vadd.f32 %v472_v10, %v471_v54  ;;  %v801_v54 = vrot.slane %v800_v33, 1  ;;  %v834_v1 = vadd.f32 %v833_v60, %v832_v37 }
 0x268   : > { %v871_v10 = vadd.f32 %v870_v52, %v869_v42 }
 0x269   : > { %v621_v16 = vrot.slane %v620_v8, 2  ;;  %1992 = vpush %v473_v59  ;;  %v802_v56 = vadd.f32 %v801_v54, %v800_v33 }
 0x26a   : > { %1994 = vpush %v525_v30 }
 0x26b   : > { %1996 = vpush %v577_v17  ;;  %v622_v23 = vadd.f32 %v621_v16, %v620_v8  ;;  %v982_v8 = vmul.f32 %v2201_v6, %v2775_v47 }
 0x26c   : > { %v759_v24 = vpop.xlane.xlu0 %758 }
 0x26d   : > { %v760_v58 = vrot.slane %v759_v24, 4  ;;  %v623_v36 = vrot.slane %v622_v23, 1  ;;  %v988_v28 = vrot.slane %v982_v8, 1 }
 0x26f   : > { %v761_v29 = vadd.f32 %v760_v58, %v759_v24  ;;  %v624_v20 = vadd.f32 %v623_v36, %v622_v23  ;;  %v2949_v23 = vsel %vm330_vm2, %v2939_v46, %v2942_v22  ;;  %v2958_v24 = vrot.slane %v2704_v38, 7  ;;  %v376_v36 = vld [vmem:[#allocation3] sm:$0xff] }
 0x270   : > { %v2953_v35 = vpack.i.bf16 %v2949_v23, %v2939_v46 }
 0x271   : > { %v762_v34 = vrot.slane %v761_v29, 2  ;;  %1998 = vpush %v624_v20  ;;  %v2962_v25 = vpack.i.bf16 %v2958_v24, %v2942_v22 }
 0x272   : > { %2000 = vpush %v671_v2 }
 0x273   : > { %2002 = vpush %v718_v44  ;;  %v763_v45 = vadd.f32 %v762_v34, %v761_v29 }
 0x275   : > { %v764_v57 = vrot.slane %v763_v45, 1 }
 0x277   : > { %v765_v53 = vadd.f32 %v764_v57, %v763_v45 }
 0x279   : > { %2004 = vpush %v765_v53 }
 0x27a   : > { %2006 = vpush %v802_v56 }
 0x27b   : > { %2008 = vpush %v834_v1 }
 0x27c   : > { %2010 = vpush %v871_v10 }
 0x27d   : > { %2012 = vpush %v908_v55 }
 0x27f   : > { %v2204_v7 = vpop.permute.xlu0 %2203 }
 0x280   : > { %v2206_v59 = vunpack.i.h.bf16 %v2204_v7  ;;  %v2205_v11 = vunpack.i.l.bf16 %v2204_v7 }
 0x282   : > { %v984_v30 = vmul.f32 %v2206_v59, %v2766_v14  ;;  %v983_v13 = vmul.f32 %v2205_v11, %v2761_v63 }
 0x284   : > { %v991_v16 = vrot.slane %v984_v30, 1  ;;  %v989_v17 = vrot.slane %v983_v13, 1 }
 0x286   : > { %v992_v18 = vsel %vm937_vm6, %v989_v17, %v991_v16  ;;  %v990_v19 = vsel %vm937_vm6, %v988_v28, %v989_v17 }
 0x287   : > { %995 = vrot.lane.b32.xlu0 %v992_v18, %s2463_s29  ;;  %993 = vrot.lane.b32.xlu1 %v990_v19, %s2463_s29  ;;  %v2984_v19 = vld [vmem:[#allocation3 + $0x8] sm:$0xff] }
 0x28f   : > { %2208 = vrot.lane.b32.xlu0 %v2953_v35, %s2462_s25 }
 0x297   : > { %2213 = vrot.lane.b32.xlu0 %v2962_v25, %s2462_s25 }
 0x29a   : > { %s1993_s17 = spop %1992 }
 0x29b   : > { %v475_v40 = vstv %s1993_s17  ;;  %s1995_s24 = spop %1994 }
 0x29c   : > { %v476_v58 = vmul.f32 0.00390625, %v475_v40  ;;  %v527_v27 = vstv %s1995_s24  ;;  %s1997_s19 = spop %1996 }
 0x29d   : > { %v528_v41 = vmul.f32 0.00390625, %v527_v27  ;;  %v579_v2 = vstv %s1997_s19 }
 0x29e   : > { %v477_v26 = vmul.f32 %v476_v58, %v376_v36  ;;  %v580_v44 = vmul.f32 0.00390625, %v579_v2 }
 0x29f   : > { %v529_v29 = vmul.f32 %v528_v41, %v376_v36 }
 0x2a0   : > { %479 = vst [vmem:[#allocation1] sm:$0xff] %v477_v26  ;;  %v581_v45 = vmul.f32 %v580_v44, %v376_v36 }
 0x2a2   : > { %s1999_s15 = spop %1998 }
 0x2a3   : > { %v626_v54 = vstv %s1999_s15  ;;  %s2001_s18 = spop %2000 }
 0x2a4   : > { %v627_v52 = vmul.f32 0.00390625, %v626_v54  ;;  %v673_v1 = vstv %s2001_s18  ;;  %s2003_s1 = spop %2002 }
 0x2a5   : > { %v674_v10 = vmul.f32 0.00390625, %v673_v1  ;;  %v720_v7 = vstv %s2003_s1  ;;  %s1839_s1 = scalar_lea.hbm %s3326_s5, %s2569_s6 }
 0x2a6   : > { %v628_v0 = vmul.f32 %v627_v52, %v376_v36  ;;  %v721_v8 = vmul.f32 0.00390625, %v720_v7 }
 0x2a7   : > { %v2970_v20 = vld [vmem:[#allocation1 + $0x1] ss:$9 sm:$0xff]  ;;  %v675_v55 = vmul.f32 %v674_v10, %v376_v36 }
 0x2a8   : > { %531 = vst [vmem:[#allocation1] sm:$0xff] %v529_v29  ;;  %v953_v33 = vpop.xlane.xlu2 %952  ;;  %v722_v59 = vmul.f32 %v721_v8, %v376_v36 }
 0x2a9   : > { %v954_v34 = vrot.slane %v953_v33, 4 }
 0x2aa   : > { %s2005_s12 = spop %2004 }
 0x2ab   : > { %v955_v37 = vadd.f32 %v954_v34, %v953_v33  ;;  %v767_v30 = vstv %s2005_s12  ;;  %s2980_s27 = spop %2006  ;;  %s300_s12 = scalar_lea.vmem [#allocation9], %s2634_s3 }
 0x2ac   : > { %v768_v13 = vmul.f32 0.00390625, %v767_v30  ;;  %s2009_s28 = spop %2008 }
 0x2ad   : > { %v956_v42 = vrot.slane %v955_v37, 2  ;;  %v836_v17 = vstv %s2009_s28  ;;  %s2011_s14 = spop %2010 }
 0x2ae   : > { %v769_v28 = vmul.f32 %v768_v13, %v376_v36  ;;  %v837_v18 = vmul.f32 0.00390625, %v836_v17  ;;  %v873_v26 = vstv %s2011_s14  ;;  %s2013_s30 = spop %2012 }
 0x2af   : > { %v2972_v43 = vld [vmem:[#allocation1 + $0x2] ss:$9 sm:$0xff]  ;;  %v957_v57 = vadd.f32 %v956_v42, %v955_v37  ;;  %v874_v27 = vmul.f32 0.00390625, %v873_v26  ;;  %v910_v36 = vstv %s2013_s30 }
 0x2b0   : > { %583 = vst [vmem:[#allocation1] sm:$0xff] %v581_v45  ;;  %v838_v40 = vmul.f32 %v837_v18, %v2984_v19  ;;  %v911_v2 = vmul.f32 0.00390625, %v910_v36  ;;  %v3006_v18 = vrot.slane %v2706_v39, 7 }
 0x2b1   : > { %v958_v60 = vrot.slane %v957_v57, 1  ;;  %v875_v41 = vmul.f32 %v874_v27, %v2984_v19 }
 0x2b2   : > { %v912_v33 = vmul.f32 %v911_v2, %v2984_v19  ;;  %v3013_v27 = vsel %vm330_vm2, %v2958_v24, %v3006_v18 }
 0x2b3   : > { %v959_v53 = vadd.f32 %v958_v60, %v957_v57 }
 0x2b5   : > { %2014 = vpush %v959_v53 }
 0x2b7   : > { %v2974_v56 = vld [vmem:[#allocation1 + $0x3] ss:$9 sm:$0xff] }
 0x2b8   : > { %630 = vst [vmem:[#allocation1] sm:$0xff] %v628_v0 }
 0x2bf   : > { %v2976_v6 = vld [vmem:[#allocation1 + $0x4] ss:$9 sm:$0xff] }
 0x2c0   : > { %677 = vst [vmem:[#allocation1] sm:$0xff] %v675_v55 }
 0x2c7   : > { %v2978_v11 = vld [vmem:[#allocation1 + $0x5] ss:$9 sm:$0xff] }
 0x2c8   : > { %724 = vst [vmem:[#allocation1] sm:$0xff] %v722_v59 }
 0x2cf   : > { %v2982_v16 = vld [vmem:[#allocation1 + $0x6] ss:$9 sm:$0xff] }
 0x2d0   : > { %771 = vst [vmem:[#allocation1] sm:$0xff] %v769_v28 }
 0x2d7   : > { %v2987_v58 = vld [vmem:[#allocation1 + $0x7] ss:$9 sm:$0xff] }
 0x2d8   : > { %840 = vst [vmem:[#allocation1] sm:$0xff] %v838_v40 }
 0x2df   : > { %v2990_v29 = vld [vmem:[#allocation1 + $0x1] ss:$9 sm:$0xff] }
 0x2e0   : > { %877 = vst [vmem:[#allocation1] sm:$0xff] %v875_v41  ;;  %v3017_v41 = vpack.i.bf16 %v3006_v18, %v3013_v27 }
 0x2e6   : > { %s2015_s16 = spop %2014 }
 0x2e7   : > { %v2993_v34 = vld [vmem:[#allocation1 + $0x2] ss:$9 sm:$0xff]  ;;  %v961_v44 = vstv %s2015_s16 }
 0x2e8   : > { %914 = vst [vmem:[#allocation1] sm:$0xff] %v912_v33  ;;  %v962_v37 = vmul.f32 0.00390625, %v961_v44 }
 0x2ea   : > { %v963_v42 = vmul.f32 %v962_v37, %v2984_v19 }
 0x2ef   : > { %v2996_v45 = vld [vmem:[#allocation1 + $0x3] ss:$9 sm:$0xff] }
 0x2f0   : > { %965 = vst [vmem:[#allocation1] sm:$0xff] %v963_v42 }
 0x2f9   : > { %v996_v54 = vpop.permute.xlu0 %995  ;;  %v994_v57 = vpop.permute.xlu1 %993 }
 0x2fa   : > { %v1000_v60 = vsel %vm313_vm1, %v996_v54, 0.0  ;;  %v999_v52 = vsel %vm313_vm1, %v994_v57, 0.0 }
 0x2fb   : > { %v1001_v53 = vadd.f32 %v1000_v60, %v999_v52 }
 0x2fd   : > { %1002 = vadd.xlane.f32.xlu1 %v1001_v53 }
 0x301   : > { %v2209_v0 = vpop.permute.xlu0 %2208 }
 0x302   : > { %v2211_v1 = vunpack.i.h.bf16 %v2209_v0  ;;  %v2210_v10 = vunpack.i.l.bf16 %v2209_v0 }
 0x304   : > { %v1033_v55 = vmul.f32 %v2211_v1, %v2761_v63  ;;  %v1032_v7 = vmul.f32 %v2210_v10, %v2775_v47 }
 0x306   : > { %v1039_v8 = vrot.slane %v1033_v55, 1  ;;  %v1038_v59 = vrot.slane %v1032_v7, 1 }
 0x308   : > { %v1040_v30 = vsel %vm937_vm6, %v1038_v59, %v1039_v8 }
 0x309   : > { %v2214_v13 = vpop.permute.xlu0 %2213  ;;  %1043 = vrot.lane.b32.xlu0 %v1040_v30, %s2463_s29 }
 0x30a   : > { %v2215_v28 = vunpack.i.l.bf16 %v2214_v13  ;;  %v2216_v1 = vunpack.i.h.bf16 %v2214_v13 }
 0x30c   : > { %v1034_v17 = vmul.f32 %v2215_v28, %v2766_v14 }
 0x30e   : > { %v1041_v40 = vrot.slane %v1034_v17, 1 }
 0x310   : > { %v1042_v26 = vsel %vm937_vm6, %v1039_v8, %v1041_v40 }
 0x311   : > { %1045 = vrot.lane.b32.xlu2 %v1042_v26, %s2463_s29 }
 0x316   : > { %2218 = vrot.lane.b32.xlu1 %v3017_v41, %s2462_s25 }
 0x31e   : > { %2223 = vrot.lane.b32.xlu1 %v2750_v51, %s2461_s8  ;;  %v1082_v51 = vmul.f32 %v2216_v1, %v2775_v47 }
 0x320   : > { %v1088_v59 = vrot.slane %v1082_v51, 1 }
 0x36b   : > { %v1046_v42 = vpop.permute.xlu2 %1045 }
 0x36c   : > { %v1050_v52 = vsel %vm313_vm1, %v1046_v42, 0.0 }
 0x370   : > { %v1003_v36 = vpop.xlane.xlu1 %1002 }
 0x371   : > { %v1004_v2 = vrot.slane %v1003_v36, 4 }
 0x373   : > { %v1005_v33 = vadd.f32 %v1004_v2, %v1003_v36 }
 0x375   : > { %v1006_v44 = vrot.slane %v1005_v33, 2 }
 0x377   : > { %v1007_v37 = vadd.f32 %v1006_v44, %v1005_v33 }
 0x379   : > { %v1008_v54 = vrot.slane %v1007_v37, 1 }
 0x37b   : > { %v1044_v57 = vpop.permute.xlu0 %1043  ;;  %v1009_v60 = vadd.f32 %v1008_v54, %v1007_v37 }
 0x37c   : > { %v1049_v53 = vsel %vm313_vm1, %v1044_v57, 0.0 }
 0x37d   : > { %2016 = vpush %v1009_v60  ;;  %v1051_v0 = vadd.f32 %v1050_v52, %v1049_v53  ;;  %v3039_v53 = vld [vmem:[#allocation1 + $0x4] ss:$9 sm:$0xff] }
 0x37f   : > { %1052 = vadd.xlane.f32.xlu0 %v1051_v0 }
 0x388   : > { %v2219_v10 = vpop.permute.xlu1 %2218 }
 0x389   : > { %v2220_v55 = vunpack.i.l.bf16 %v2219_v10  ;;  %v2221_v7 = vunpack.i.h.bf16 %v2219_v10 }
 0x38b   : > { %v1083_v8 = vmul.f32 %v2220_v55, %v2761_v63  ;;  %v1084_v28 = vmul.f32 %v2221_v7, %v2766_v14 }
 0x38d   : > { %v1089_v30 = vrot.slane %v1083_v8, 1  ;;  %v1091_v2 = vrot.slane %v1084_v28, 1 }
 0x38f   : > { %v1090_v17 = vsel %vm937_vm6, %v1088_v59, %v1089_v30  ;;  %v1092_v54 = vsel %vm937_vm6, %v1089_v30, %v1091_v2 }
 0x390   : > { %v2224_v40 = vpop.permute.xlu1 %2223  ;;  %1093 = vrot.lane.b32.xlu2 %v1090_v17, %s2463_s29 }
 0x391   : > { %v2226_v26 = vunpack.i.h.bf16 %v2224_v40  ;;  %v2225_v36 = vunpack.i.l.bf16 %v2224_v40 }
 0x393   : > { %v1130_v13 = vmul.f32 %v2226_v26, %v2761_v63  ;;  %v1129_v33 = vmul.f32 %v2225_v36, %v2775_v47  ;;  %2228 = vrot.lane.b32.xlu0 %v2878_v62, %s2461_s8 }
 0x395   : > { %v1136_v44 = vrot.slane %v1130_v13, 1  ;;  %v1135_v37 = vrot.slane %v1129_v33, 1 }
 0x397   : > { %v1137_v42 = vsel %vm937_vm6, %v1135_v37, %v1136_v44 }
 0x398   : > { %1140 = vrot.lane.b32.xlu1 %v1137_v42, %s2464_s7  ;;  %1095 = vrot.lane.b32.xlu2 %v1092_v54, %s2463_s29 }
 0x3ae   : > { %s2017_s17 = spop %2016 }
 0x3af   : > { %v1011_v57 = vstv %s2017_s17 }
 0x3b0   : > { %v1012_v60 = vmul.f32 0.00390625, %v1011_v57 }
 0x3b2   : > { %v1013_v52 = vmul.f32 %v1012_v60, %v2984_v19 }
 0x3b4   : > { %1015 = vst [vmem:[#allocation1] sm:$0xff] %v1013_v52 }
 0x3bb   : > { %v3049_v54 = vld [vmem:[#allocation1 + $0x5] ss:$9 sm:$0xff] }
 0x3ea   : > { %v1094_v0 = vpop.permute.xlu2 %1093 }
 0x3eb   : > { %v1099_v10 = vsel %vm313_vm1, %v1094_v0, 0.0 }
 0x3f2   : > { %v1053_v62 = vpop.xlane.xlu0 %1052  ;;  %v1096_v1 = vpop.permute.xlu2 %1095 }
 0x3f3   : > { %v1054_v51 = vrot.slane %v1053_v62, 4  ;;  %v1100_v55 = vsel %vm313_vm1, %v1096_v1, 0.0 }
 0x3f4   : > { %v1101_v7 = vadd.f32 %v1100_v55, %v1099_v10 }
 0x3f5   : > { %v1055_v8 = vadd.f32 %v1054_v51, %v1053_v62 }
 0x3f6   : > { %1102 = vadd.xlane.f32.xlu2 %v1101_v7 }
 0x3f7   : > { %v1056_v59 = vrot.slane %v1055_v8, 2 }
 0x3f9   : > { %v1057_v30 = vadd.f32 %v1056_v59, %v1055_v8 }
 0x3fb   : > { %v1058_v28 = vrot.slane %v1057_v30, 1 }
 0x3fd   : > { %v1059_v17 = vadd.f32 %v1058_v28, %v1057_v30 }
 0x3ff   : > { %2018 = vpush %v1059_v17 }
 0x405   : > { %v2229_v40 = vpop.permute.xlu0 %2228 }
 0x406   : > { %v2230_v26 = vunpack.i.l.bf16 %v2229_v40  ;;  %v2231_v8 = vunpack.i.h.bf16 %v2229_v40 }
 0x408   : > { %v1131_v36 = vmul.f32 %v2230_v26, %v2766_v14  ;;  %v1171_v30 = vmul.f32 %v2231_v8, %v2775_v47 }
 0x40a   : > { %v1138_v2 = vrot.slane %v1131_v36, 1  ;;  %v1141_v10 = vpop.permute.xlu1 %1140  ;;  %v1177_v36 = vrot.slane %v1171_v30, 1 }
 0x40c   : > { %v1139_v13 = vsel %vm937_vm6, %v1136_v44, %v1138_v2 }
 0x40d   : > { %1142 = vrot.lane.b32.xlu1 %v1139_v13, %s2464_s7 }
 0x415   : > { %2233 = vrot.lane.b32.xlu1 %v2920_v15, %s2461_s8  ;;  %v1146_v15 = vsel %vm313_vm1, %v1141_v10, 0.0 }
 0x430   : > { %s2019_s24 = spop %2018 }
 0x431   : > { %v1061_v33 = vstv %s2019_s24 }
 0x432   : > { %v1062_v37 = vmul.f32 0.00390625, %v1061_v33 }
 0x434   : > { %v1063_v42 = vmul.f32 %v1062_v37, %v2984_v19 }
 0x436   : > { %1065 = vst [vmem:[#allocation1] sm:$0xff] %v1063_v42 }
 0x469   : > { %v1103_v57 = vpop.xlane.xlu2 %1102 }
 0x46a   : > { %v1104_v60 = vrot.slane %v1103_v57, 4 }
 0x46c   : > { %v1105_v52 = vadd.f32 %v1104_v60, %v1103_v57 }
 0x46e   : > { %v1106_v0 = vrot.slane %v1105_v52, 2 }
 0x470   : > { %v1107_v62 = vadd.f32 %v1106_v0, %v1105_v52  ;;  %v3063_v52 = vld [vmem:[#allocation1 + $0x6] ss:$9 sm:$0xff] }
 0x472   : > { %v1108_v1 = vrot.slane %v1107_v62, 1 }
 0x474   : > { %v1109_v44 = vadd.f32 %v1108_v1, %v1107_v62 }
 0x476   : > { %2020 = vpush %v1109_v44 }
 0x47f   : > { %v1143_v51 = vpop.permute.xlu1 %1142 }
 0x480   : > { %v1147_v55 = vsel %vm313_vm1, %v1143_v51, 0.0 }
 0x481   : > { %v1148_v7 = vadd.f32 %v1147_v55, %v1146_v15 }
 0x483   : > { %1149 = vadd.xlane.f32.xlu0 %v1148_v7 }
 0x487   : > { %v2234_v59 = vpop.permute.xlu1 %2233 }
 0x488   : > { %v2235_v28 = vunpack.i.l.bf16 %v2234_v59  ;;  %v2236_v17 = vunpack.i.h.bf16 %v2234_v59 }
 0x48a   : > { %v1172_v26 = vmul.f32 %v2235_v28, %v2761_v63  ;;  %v1173_v13 = vmul.f32 %v2236_v17, %v2766_v14 }
 0x48c   : > { %v1178_v2 = vrot.slane %v1172_v26, 1  ;;  %v1180_v37 = vrot.slane %v1173_v13, 1 }
 0x48e   : > { %v1179_v33 = vsel %vm937_vm6, %v1177_v36, %v1178_v2  ;;  %v1181_v42 = vsel %vm937_vm6, %v1178_v2, %v1180_v37 }
 0x48f   : > { %1182 = vrot.lane.b32.xlu1 %v1179_v33, %s2464_s7 }
 0x497   : > { %1184 = vrot.lane.b32.xlu1 %v1181_v42, %s2464_s7 }
 0x49f   : > { %2238 = vrot.lane.b32.xlu1 %v2953_v35, %s2461_s8 }
 0x4a7   : > { %s2021_s19 = spop %2020 }
 0x4a8   : > { %v1111_v40 = vstv %s2021_s19 }
 0x4a9   : > { %v1112_v57 = vmul.f32 0.00390625, %v1111_v40 }
 0x4ab   : > { %v1113_v60 = vmul.f32 %v1112_v57, %v2984_v19 }
 0x4ad   : > { %1115 = vst [vmem:[#allocation1] sm:$0xff] %v1113_v60 }
 0x4f6   : > { %v1150_v0 = vpop.xlane.xlu0 %1149 }
 0x4f7   : > { %v1151_v62 = vrot.slane %v1150_v0, 4 }
 0x4f9   : > { %v1152_v1 = vadd.f32 %v1151_v62, %v1150_v0 }
 0x4fb   : > { %v1153_v44 = vrot.slane %v1152_v1, 2 }
 0x4fd   : > { %v1154_v10 = vadd.f32 %v1153_v44, %v1152_v1 }
 0x4ff   : > { %v1155_v51 = vrot.slane %v1154_v10, 1 }
 0x501   : > { %v1183_v15 = vpop.permute.xlu1 %1182  ;;  %v1156_v55 = vadd.f32 %v1155_v51, %v1154_v10 }
 0x502   : > { %v1188_v35 = vsel %vm313_vm1, %v1183_v15, 0.0 }
 0x503   : > { %2022 = vpush %v1156_v55 }
 0x509   : > { %v1185_v7 = vpop.permute.xlu1 %1184 }
 0x50a   : > { %v1189_v8 = vsel %vm313_vm1, %v1185_v7, 0.0 }
 0x50b   : > { %v1190_v59 = vadd.f32 %v1189_v8, %v1188_v35 }
 0x50d   : > { %1191 = vadd.xlane.f32.xlu2 %v1190_v59 }
 0x511   : > { %v2239_v19 = vpop.permute.xlu1 %2238 }
 0x512   : > { %v2241_v30 = vunpack.i.h.bf16 %v2239_v19  ;;  %v2240_v28 = vunpack.i.l.bf16 %v2239_v19 }
 0x514   : > { %v1219_v17 = vmul.f32 %v2241_v30, %v2761_v63  ;;  %v1218_v26 = vmul.f32 %v2240_v28, %v2775_v47 }
 0x516   : > { %v1225_v36 = vrot.slane %v1219_v17, 1  ;;  %v1224_v2 = vrot.slane %v1218_v26, 1 }
 0x518   : > { %v1226_v13 = vsel %vm937_vm6, %v1224_v2, %v1225_v36  ;;  %v2257_v2 = vpack.i.bf16 %v2672_v21, %v2648_v4 }
 0x519   : > { %1229 = vrot.lane.b32.xlu1 %v1226_v13, %s2464_s7  ;;  %v2262_v13 = vpack.i.bf16 %v2690_v32, %v2688_v31 }
 0x521   : > { %2248 = vrot.lane.b32.xlu1 %v3017_v41, %s2461_s8 }
 0x525   : > { %2243 = vrot.lane.b32.xlu2 %v2962_v25, %s2461_s8 }
 0x534   : > { %s3094_s15 = spop %2022 }
 0x580   : > { %v1192_v33 = vpop.xlane.xlu2 %1191 }
 0x581   : > { %v1193_v37 = vrot.slane %v1192_v33, 4 }
 0x583   : > { %v1194_v42 = vadd.f32 %v1193_v37, %v1192_v33  ;;  %v2267_v37 = vpack.i.bf16 %v2706_v39, %v2704_v38 }
 0x585   : > { %v1195_v40 = vrot.slane %v1194_v42, 2 }
 0x587   : > { %v1196_v57 = vadd.f32 %v1195_v40, %v1194_v42  ;;  %v3098_v40 = vld [vmem:[#allocation3 + $0x10] sm:$0xff] }
 0x588   : > { %v2244_v60 = vpop.permute.xlu2 %2243 }
 0x589   : > { %v2245_v0 = vunpack.i.l.bf16 %v2244_v60  ;;  %v1197_v62 = vrot.slane %v1196_v57, 1  ;;  %v2246_v41 = vunpack.i.h.bf16 %v2244_v60  ;;  %v3101_v60 = vld [vmem:[#allocation1 + $0x7] ss:$9 sm:$0xff] }
 0x58b   : > { %v1220_v1 = vmul.f32 %v2245_v0, %v2766_v14  ;;  %v1230_v44 = vpop.permute.xlu1 %1229  ;;  %v1198_v10 = vadd.f32 %v1197_v62, %v1196_v57  ;;  %v1265_v55 = vmul.f32 %v2246_v41, %v2775_v47 }
 0x58c   : > { %v1235_v41 = vsel %vm313_vm1, %v1230_v44, 0.0 }
 0x58d   : > { %v1227_v51 = vrot.slane %v1220_v1, 1  ;;  %2024 = vpush %v1198_v10  ;;  %v1271_v59 = vrot.slane %v1265_v55, 1 }
 0x58f   : > { %v1228_v15 = vsel %vm937_vm6, %v1225_v36, %v1227_v51  ;;  %v2252_v36 = vpack.i.bf16 %v2646_v3, %v2650_v5 }
 0x590   : > { %1231 = vrot.lane.b32.xlu0 %v1228_v15, %s2464_s7 }
 0x593   : > { %v2249_v25 = vpop.permute.xlu1 %2248 }
 0x594   : > { %v2250_v7 = vunpack.i.l.bf16 %v2249_v25  ;;  %v2251_v35 = vunpack.i.h.bf16 %v2249_v25 }
 0x596   : > { %v1266_v8 = vmul.f32 %v2250_v7, %v2761_v63  ;;  %v1267_v30 = vmul.f32 %v2251_v35, %v2766_v14 }
 0x598   : > { %v1272_v19 = vrot.slane %v1266_v8, 1  ;;  %v1274_v17 = vrot.slane %v1267_v30, 1 }
 0x59a   : > { %v1273_v28 = vsel %vm937_vm6, %v1271_v59, %v1272_v19  ;;  %v1275_v26 = vsel %vm937_vm6, %v1272_v19, %v1274_v17 }
 0x59b   : > { %1276 = vrot.lane.b32.xlu2 %v1273_v28, %s2464_s7 }
 0x5a3   : > { %1278 = vrot.lane.b32.xlu2 %v1275_v26, %s2464_s7 }
 0x5ab   : > { %2253 = vrot.lane.b32.xlu2 %v2252_v36, %s2462_s25 }
 0x5b3   : > { %2258 = vrot.lane.b32.xlu2 %v2257_v2, %s2462_s25 }
 0x5bb   : > { %2263 = vrot.lane.b32.xlu2 %v2262_v13, %s2462_s25 }
 0x5be   : > { %s2025_s18 = spop %2024 }
 0x5bf   : > { %v1200_v33 = vstv %s2025_s18 }
 0x5c0   : > { %v1201_v42 = vmul.f32 0.00390625, %v1200_v33 }
 0x5c2   : > { %v1202_v57 = vmul.f32 %v1201_v42, %v3098_v40 }
 0x5c3   : > { %2268 = vrot.lane.b32.xlu2 %v2267_v37, %s2462_s25 }
 0x5c4   : > { %1204 = vst [vmem:[#allocation1] sm:$0xff] %v1202_v57 }
 0x5cb   : > { %2278 = vrot.lane.b32.xlu2 %v2257_v2, %s2461_s8 }
 0x5f5   : > { %v1277_v0 = vpop.permute.xlu2 %1276 }
 0x5f6   : > { %v1282_v1 = vsel %vm313_vm1, %v1277_v0, 0.0 }
 0x5fd   : > { %v1279_v62 = vpop.permute.xlu2 %1278 }
 0x5fe   : > { %v1283_v10 = vsel %vm313_vm1, %v1279_v62, 0.0 }
 0x5ff   : > { %v1284_v51 = vadd.f32 %v1283_v10, %v1282_v1 }
 0x601   : > { %1285 = vadd.xlane.f32.xlu0 %v1284_v51 }
 0x602   : > { %v1232_v15 = vpop.permute.xlu0 %1231 }
 0x603   : > { %v1236_v25 = vsel %vm313_vm1, %v1232_v15, 0.0  ;;  %v1344_v15 = vmul.f32 %v2916_v12, %v2761_v63  ;;  %v1308_v12 = vmul.f32 %v2738_v49, %v2766_v14 }
 0x604   : > { %v1237_v55 = vadd.f32 %v1236_v25, %v1235_v41  ;;  %v1345_v41 = vmul.f32 %v2911_v9, %v2766_v14 }
 0x605   : > { %v2254_v7 = vpop.permute.xlu2 %2253 }
 0x606   : > { %v2255_v35 = vunpack.i.l.bf16 %v2254_v7  ;;  %1238 = vadd.xlane.f32.xlu1 %v1237_v55  ;;  %v2256_v59 = vunpack.i.h.bf16 %v2254_v7  ;;  %v1350_v55 = vrot.slane %v1344_v15, 1  ;;  %v1352_v7 = vrot.slane %v1345_v41, 1 }
 0x608   : > { %v1457_v8 = vmul.f32 %v2255_v35, %v2775_v47  ;;  %v1458_v30 = vmul.f32 %v2256_v59, %v2761_v63  ;;  %v1306_v59 = vmul.f32 %v2735_v48, %v2775_v47 }
 0x60a   : > { %1461 = vrot.lane.b32.xlu2 %v1457_v8, %s2463_s29  ;;  %v1353_v8 = vsel %vm937_vm6, %v1350_v55, %v1352_v7 }
 0x60b   : > { %v1357_v9 = vsel %vm313_vm1, %v1353_v8, 0.0 }
 0x60d   : > { %v2259_v19 = vpop.permute.xlu2 %2258 }
 0x60e   : > { %v2261_v28 = vunpack.i.h.bf16 %v2259_v19  ;;  %v2260_v62 = vunpack.i.l.bf16 %v2259_v19 }
 0x610   : > { %v1490_v26 = vmul.f32 %v2261_v28, %v2761_v63  ;;  %v1489_v10 = vmul.f32 %v2260_v62, %v2775_v47 }
 0x612   : > { %1463 = vrot.lane.b32.xlu2 %v1458_v30, %s2463_s29  ;;  %v1312_v30 = vrot.slane %v1306_v59, 1 }
 0x615   : > { %v2264_v17 = vpop.permute.xlu2 %2263  ;;  %2283 = vrot.lane.b32.xlu0 %v2262_v13, %s2461_s8 }
 0x616   : > { %v2265_v44 = vunpack.i.l.bf16 %v2264_v17  ;;  %v2266_v33 = vunpack.i.h.bf16 %v2264_v17  ;;  %v1315_v17 = vrot.slane %v1308_v12, 1 }
 0x618   : > { %v1526_v2 = vmul.f32 %v2265_v44, %v2775_v47  ;;  %v1527_v0 = vmul.f32 %v2266_v33, %v2761_v63 }
 0x61a   : > { %1495 = vrot.lane.b32.xlu2 %v1490_v26, %s2463_s29 }
 0x61d   : > { %v2269_v42 = vpop.permute.xlu2 %2268  ;;  %1530 = vrot.lane.b32.xlu0 %v1526_v2, %s2463_s29 }
 0x61e   : > { %v2270_v57 = vunpack.i.l.bf16 %v2269_v42  ;;  %v2271_v1 = vunpack.i.h.bf16 %v2269_v42 }
 0x61f   : > { %2273 = vrot.lane.b32.xlu1 %v2252_v36, %s2461_s8  ;;  %v1343_v36 = vmul.f32 %v2874_v61, %v2775_v47  ;;  %v1307_v61 = vmul.f32 %v2746_v50, %v2761_v63 }
 0x620   : > { %v1563_v13 = vmul.f32 %v2270_v57, %v2775_v47  ;;  %v1564_v51 = vmul.f32 %v2271_v1, %v2761_v63 }
 0x621   : > { %v1349_v25 = vrot.slane %v1343_v36, 1  ;;  %v1313_v28 = vrot.slane %v1307_v61, 1 }
 0x622   : > { %1532 = vrot.lane.b32.xlu2 %v1527_v0, %s2463_s29 }
 0x623   : > { %v1351_v35 = vsel %vm937_vm6, %v1349_v25, %v1350_v55  ;;  %v1314_v44 = vsel %vm937_vm6, %v1312_v30, %v1313_v28  ;;  %v1316_v26 = vsel %vm937_vm6, %v1313_v28, %v1315_v17  ;;  %v1419_v30 = vmul.f32 %v3006_v18, %v2766_v14 }
 0x624   : > { %v1319_v48 = vsel %vm313_vm1, %v1314_v44, 0.0  ;;  %v1320_v2 = vsel %vm313_vm1, %v1316_v26, 0.0 }
 0x625   : > { %1567 = vrot.lane.b32.xlu0 %v1563_v13, %s2463_s29  ;;  %v1321_v33 = vadd.f32 %v1320_v2, %v1319_v48  ;;  %v2279_v50 = vpop.permute.xlu2 %2278  ;;  %v1426_v48 = vrot.slane %v1419_v30, 1 }
 0x626   : > { %v2281_v42 = vunpack.i.h.bf16 %v2279_v50  ;;  %v2280_v57 = vunpack.i.l.bf16 %v2279_v50 }
 0x627   : > { %1493 = vrot.lane.b32.xlu1 %v1489_v10, %s2463_s29 }
 0x628   : > { %v1638_v49 = vmul.f32 %v2281_v42, %v2761_v63  ;;  %v1637_v0 = vmul.f32 %v2280_v57, %v2775_v47 }
 0x62a   : > { %1569 = vrot.lane.b32.xlu2 %v1564_v51, %s2463_s29 }
 0x62f   : > { %2288 = vrot.lane.b32.xlu1 %v2267_v37, %s2461_s8  ;;  %v1356_v37 = vsel %vm313_vm1, %v1351_v35, 0.0 }
 0x630   : > { %v1358_v19 = vadd.f32 %v1357_v9, %v1356_v37  ;;  %v1417_v9 = vmul.f32 %v2958_v24, %v2775_v47 }
 0x632   : > { %v1423_v28 = vrot.slane %v1417_v9, 1  ;;  %v3186_v9 = vld [vmem:[#allocation1 + $0x1] ss:$9 sm:$0xff] }
 0x64f   : > { %1359 = vadd.xlane.f32.xlu0 %v1358_v19  ;;  %v1418_v19 = vmul.f32 %v3013_v27, %v2761_v63 }
 0x651   : > { %v1424_v26 = vrot.slane %v1418_v19, 1 }
 0x653   : > { %v1427_v50 = vsel %vm937_vm6, %v1424_v26, %v1426_v48 }
 0x654   : > { %v1431_v27 = vsel %vm313_vm1, %v1427_v50, 0.0 }
 0x659   : > { %1322 = vadd.xlane.f32.xlu1 %v1321_v33  ;;  %v1425_v33 = vsel %vm937_vm6, %v1423_v28, %v1424_v26 }
 0x65a   : > { %v1430_v24 = vsel %vm313_vm1, %v1425_v33, 0.0 }
 0x663   : > { %1643 = vrot.lane.b32.xlu0 %v1638_v49, %s2464_s7  ;;  %v1432_v49 = vadd.f32 %v1431_v27, %v1430_v24 }
 0x672   : > { %1641 = vrot.lane.b32.xlu1 %v1637_v0, %s2464_s7  ;;  %v1462_v0 = vpop.permute.xlu2 %1461 }
 0x674   : > { %v1286_v62 = vpop.xlane.xlu0 %1285 }
 0x675   : > { %v1287_v13 = vrot.slane %v1286_v62, 4 }
 0x677   : > { %v1288_v1 = vadd.f32 %v1287_v13, %v1286_v62 }
 0x679   : > { %v1289_v10 = vrot.slane %v1288_v1, 2  ;;  %v1239_v51 = vpop.xlane.xlu1 %1238 }
 0x67a   : > { %v1240_v36 = vrot.slane %v1239_v51, 4  ;;  %v1464_v13 = vpop.permute.xlu2 %1463 }
 0x67b   : > { %v1290_v41 = vadd.f32 %v1289_v10, %v1288_v1 }
 0x67c   : > { %v1241_v15 = vadd.f32 %v1240_v36, %v1239_v51  ;;  %v1468_v51 = vsel %vm313_vm1, %v1464_v13, 0.0  ;;  %v1467_v36 = vsel %vm313_vm1, %v1462_v0, 0.0 }
 0x67d   : > { %v1291_v7 = vrot.slane %v1290_v41, 1 }
 0x67e   : > { %v1242_v25 = vrot.slane %v1241_v15, 2 }
 0x67f   : > { %v1292_v59 = vadd.f32 %v1291_v7, %v1290_v41  ;;  %v1469_v41 = vadd.f32 %v1468_v51, %v1467_v36 }
 0x680   : > { %v1243_v55 = vadd.f32 %v1242_v25, %v1241_v15  ;;  %v1380_v25 = vmul.f32 %v2939_v46, %v2775_v47 }
 0x682   : > { %v1244_v35 = vrot.slane %v1243_v55, 1  ;;  %v1496_v27 = vpop.permute.xlu2 %1495 }
 0x684   : > { %v1245_v8 = vadd.f32 %v1244_v35, %v1243_v55  ;;  %v1381_v35 = vmul.f32 %v2949_v23, %v2761_v63 }
 0x686   : > { %2026 = vpush %v1245_v8  ;;  %v1382_v8 = vmul.f32 %v2942_v22, %v2766_v14  ;;  %v1387_v19 = vrot.slane %v1381_v35, 1 }
 0x687   : > { %2028 = vpush %v1292_v59  ;;  %v3152_v37 = vpop.permute.xlu0 %2283 }
 0x688   : > { %v2286_v61 = vunpack.i.h.bf16 %v3152_v37  ;;  %v1389_v30 = vrot.slane %v1382_v8, 1 }
 0x68a   : > { %v1675_v12 = vmul.f32 %v2286_v61, %v2761_v63  ;;  %v1390_v28 = vsel %vm937_vm6, %v1387_v19, %v1389_v30  ;;  %v1784_v30 = vmul.f32 %v2690_v32, %v2761_v63  ;;  %v1807_v32 = vmul.f32 %v2706_v39, %v2761_v63 }
 0x68b   : > { %v1394_v14 = vsel %vm313_vm1, %v1390_v28, 0.0 }
 0x68c   : > { %1680 = vrot.lane.b32.xlu0 %v1675_v12, %s2464_s7  ;;  %v1386_v12 = vrot.slane %v1380_v25, 1 }
 0x68e   : > { %v1388_v46 = vsel %vm937_vm6, %v1386_v12, %v1387_v19  ;;  %v1783_v19 = vmul.f32 %v2688_v31, %v2775_v47 }
 0x68f   : > { %v1531_v10 = vpop.permute.xlu0 %1530  ;;  %v1393_v23 = vsel %vm313_vm1, %v1388_v46, 0.0  ;;  %v1786_v46 = vsel %vm313_vm1, %v1784_v30, 0.0 }
 0x690   : > { %v1395_v22 = vadd.f32 %v1394_v14, %v1393_v23  ;;  %v1536_v35 = vsel %vm313_vm1, %v1531_v10, 0.0  ;;  %v1806_v14 = vmul.f32 %v2704_v38, %v2775_v47 }
 0x691   : > { %v2274_v17 = vpop.permute.xlu1 %2273 }
 0x692   : > { %v2275_v44 = vunpack.i.l.bf16 %v2274_v17  ;;  %v2276_v42 = vunpack.i.h.bf16 %v2274_v17 }
 0x694   : > { %v1600_v2 = vmul.f32 %v2275_v44, %v2775_v47  ;;  %v1601_v18 = vmul.f32 %v2276_v42, %v2761_v63 }
 0x696   : > { %1604 = vrot.lane.b32.xlu2 %v1600_v2, %s2464_s7 }
 0x697   : > { %v3183_v59 = vpop.permute.xlu0 %1567 }
 0x698   : > { %v1573_v38 = vsel %vm313_vm1, %v3183_v59, 0.0 }
 0x699   : > { %v3171_v57 = vpop.permute.xlu1 %1493 }
 0x69c   : > { %1433 = vadd.xlane.f32.xlu1 %v1432_v49 }
 0x69e   : > { %1606 = vrot.lane.b32.xlu2 %v1601_v18, %s2464_s7 }
 0x6a1   : > { %v2289_v62 = vpop.permute.xlu1 %2288 }
 0x6a2   : > { %v2290_v1 = vunpack.i.l.bf16 %v2289_v62  ;;  %v2291_v44 = vunpack.i.h.bf16 %v2289_v62 }
 0x6a4   : > { %v1711_v15 = vmul.f32 %v2290_v1, %v2775_v47  ;;  %v1712_v48 = vmul.f32 %v2291_v44, %v2761_v63 }
 0x6b5   : > { %1715 = vrot.lane.b32.xlu1 %v1711_v15, %s2464_s7 }
 0x6b6   : > { %1470 = vadd.xlane.f32.xlu0 %v1469_v41 }
 0x6b7   : > { %s2027_s8 = spop %2026 }
 0x6b8   : > { %v1247_v55 = vstv %s2027_s8  ;;  %s2029_s25 = spop %2028 }
 0x6b9   : > { %v1248_v7 = vmul.f32 0.00390625, %v1247_v55  ;;  %v1294_v33 = vstv %s2029_s25  ;;  %v1533_v55 = vpop.permute.xlu2 %1532 }
 0x6ba   : > { %v1295_v49 = vmul.f32 0.00390625, %v1294_v33  ;;  %v1537_v8 = vsel %vm313_vm1, %v1533_v55, 0.0  ;;  %v1499_v33 = vsel %vm313_vm1, %v3171_v57, 0.0 }
 0x6bb   : > { %v1249_v61 = vmul.f32 %v1248_v7, %v3098_v40  ;;  %v2285_v7 = vunpack.i.l.bf16 %v3152_v37  ;;  %v1538_v12 = vadd.f32 %v1537_v8, %v1536_v35  ;;  %v1785_v37 = vsel %vm313_vm1, %v1783_v19, 0.0 }
 0x6bc   : > { %v1296_v13 = vmul.f32 %v1295_v49, %v3098_v40  ;;  %v1787_v10 = vadd.f32 %v1786_v46, %v1785_v37 }
 0x6bd   : > { %1251 = vst [vmem:[#allocation1] sm:$0xff] %v1249_v61  ;;  %v1674_v61 = vmul.f32 %v2285_v7, %v2775_v47 }
 0x6c1   : > { %v1570_v28 = vpop.permute.xlu2 %1569 }
 0x6c2   : > { %v1360_v17 = vpop.xlane.xlu0 %1359  ;;  %v1574_v39 = vsel %vm313_vm1, %v1570_v28, 0.0 }
 0x6c3   : > { %v1361_v26 = vrot.slane %v1360_v17, 4 }
 0x6c4   : > { %v3195_v36 = vld [vmem:[#allocation1 + $0x2] ss:$9 sm:$0xff] }
 0x6c5   : > { %v1362_v2 = vadd.f32 %v1361_v26, %v1360_v17  ;;  %1298 = vst [vmem:[#allocation1] sm:$0xff] %v1296_v13 }
 0x6c7   : > { %1396 = vadd.xlane.f32.xlu2 %v1395_v22  ;;  %v1363_v50 = vrot.slane %v1362_v2, 2  ;;  %v1808_v22 = vsel %vm313_vm1, %v1806_v14, 0.0 }
 0x6c9   : > { %v1364_v0 = vadd.f32 %v1363_v50, %v1362_v2  ;;  %v1500_v50 = vsel %vm313_vm1, %v1496_v27, 0.0 }
 0x6ca   : > { %1717 = vrot.lane.b32.xlu0 %v1712_v48, %s2464_s7  ;;  %v1809_v48 = vsel %vm313_vm1, %v1807_v32, 0.0 }
 0x6cb   : > { %v1365_v51 = vrot.slane %v1364_v0, 1  ;;  %v1810_v2 = vadd.f32 %v1809_v48, %v1808_v22 }
 0x6cc   : > { %v1323_v24 = vpop.xlane.xlu1 %1322 }
 0x6cd   : > { %v1324_v42 = vrot.slane %v1323_v24, 4  ;;  %v1366_v25 = vadd.f32 %v1365_v51, %v1364_v0  ;;  %v1575_v0 = vadd.f32 %v1574_v39, %v1573_v38 }
 0x6cf   : > { %v1325_v18 = vadd.f32 %v1324_v42, %v1323_v24  ;;  %v1501_v24 = vadd.f32 %v1500_v50, %v1499_v33 }
 0x6d1   : > { %v1326_v62 = vrot.slane %v1325_v18, 2 }
 0x6d3   : > { %v1327_v1 = vadd.f32 %v1326_v62, %v1325_v18  ;;  %v3223_v62 = vld [vmem:[#allocation1 + $0x3] ss:$9 sm:$0xff] }
 0x6d5   : > { %v1328_v15 = vrot.slane %v1327_v1, 1  ;;  %v1644_v57 = vpop.permute.xlu0 %1643 }
 0x6d7   : > { %v1329_v41 = vadd.f32 %v1328_v15, %v1327_v1  ;;  %v1648_v1 = vsel %vm313_vm1, %v1644_v57, 0.0  ;;  %v1743_v57 = vmul.f32 %v2646_v3, %v2761_v63  ;;  %v381_v3 = vld [vmem:[%s3323_s2] sm:$0x1] }
 0x6d9   : > { %2030 = vpush %v1329_v41 }
 0x6da   : > { %2032 = vpush %v1366_v25 }
 0x6df   : > { %1539 = vadd.xlane.f32.xlu1 %v1538_v12  ;;  %1678 = vrot.lane.b32.xlu2 %v1674_v61, %s2464_s7 }
 0x6e4   : > { %v1642_v13 = vpop.permute.xlu1 %1641 }
 0x6e5   : > { %v1647_v27 = vsel %vm313_vm1, %v1642_v13, 0.0  ;;  %v1742_v13 = vmul.f32 %v2650_v5, %v2775_v47  ;;  %v1761_v5 = vmul.f32 %v2672_v21, %v2761_v63 }
 0x6e6   : > { %v1649_v51 = vadd.f32 %v1648_v1, %v1647_v27  ;;  %v428_v1 = vstv %s2968_s13 }
 0x6e7   : > { %1788 = vadd.xlane.f32.xlu1 %v1787_v10  ;;  %v1744_v27 = vsel %vm313_vm1, %v1742_v13, 0.0 }
 0x6f0   : > { %v1605_v17 = vpop.permute.xlu2 %1604 }
 0x6f1   : > { %v1610_v44 = vsel %vm313_vm1, %v1605_v17, 0.0 }
 0x6f8   : > { %v1607_v23 = vpop.permute.xlu2 %1606 }
 0x6f9   : > { %v1611_v26 = vsel %vm313_vm1, %v1607_v23, 0.0 }
 0x6fa   : > { %v1612_v31 = vadd.f32 %v1611_v26, %v1610_v44 }
 0x6fc   : > { %1613 = vadd.xlane.f32.xlu0 %v1612_v31 }
 0x6fe   : > { %v1681_v55 = vpop.permute.xlu0 %1680 }
 0x6ff   : > { %v1685_v32 = vsel %vm313_vm1, %v1681_v55, 0.0  ;;  %v429_v55 = vmul.f32 0.00390625, %v428_v1 }
 0x704   : > { %1811 = vadd.xlane.f32.xlu0 %v1810_v2 }
 0x708   : > { %1502 = vadd.xlane.f32.xlu2 %v1501_v24 }
 0x70a   : > { %s2031_s29 = spop %2030 }
 0x70b   : > { %v1331_v42 = vstv %s2031_s29  ;;  %s2033_s7 = spop %2032 }
 0x70c   : > { %v1332_v49 = vmul.f32 0.00390625, %v1331_v42  ;;  %v1368_v59 = vstv %s2033_s7 }
 0x70d   : > { %v1369_v15 = vmul.f32 0.00390625, %v1368_v59 }
 0x70e   : > { %v1333_v18 = vmul.f32 %v1332_v49, %v3098_v40 }
 0x70f   : > { %v1370_v41 = vmul.f32 %v1369_v15, %v3098_v40  ;;  %v1434_v7 = vpop.xlane.xlu1 %1433  ;;  %v326_v15 = vstv %s2966_s11 }
 0x710   : > { %1576 = vadd.xlane.f32.xlu2 %v1575_v0  ;;  %1335 = vst [vmem:[#allocation1] sm:$0xff] %v1333_v18  ;;  %v1435_v8 = vrot.slane %v1434_v7, 4 }
 0x712   : > { %v1436_v12 = vadd.f32 %v1435_v8, %v1434_v7  ;;  %v327_v7 = vmul.f32 0.00390625, %v326_v15  ;;  %v2292_v8 = vld [vmem:[#allocation3] sm:$0xff] }
 0x714   : > { %v1437_v30 = vrot.slane %v1436_v12, 2 }
 0x716   : > { %v1438_v17 = vadd.f32 %v1437_v30, %v1436_v12  ;;  %v1763_v12 = vsel %vm313_vm1, %v1761_v5, 0.0 }
 0x717   : > { %v3228_v25 = vld [vmem:[#allocation1 + $0x4] ss:$9 sm:$0xff] }
 0x718   : > { %1650 = vadd.xlane.f32.xlu2 %v1649_v51  ;;  %1372 = vst [vmem:[#allocation1] sm:$0xff] %v1370_v41  ;;  %v1439_v14 = vrot.slane %v1438_v17, 1  ;;  %v1745_v51 = vsel %vm313_vm1, %v1743_v57, 0.0  ;;  %v1760_v41 = vmul.f32 %v2648_v4, %v2775_v47 }
 0x719   : > { %v1746_v59 = vadd.f32 %v1745_v51, %v1744_v27 }
 0x71a   : > { %v1440_v38 = vadd.f32 %v1439_v14, %v1438_v17 }
 0x727   : > { %v1716_v49 = vpop.permute.xlu1 %1715 }
 0x728   : > { %v1721_v18 = vsel %vm313_vm1, %v1716_v49, 0.0 }
 0x729   : > { %v1471_v35 = vpop.xlane.xlu0 %1470 }
 0x72a   : > { %v1472_v61 = vrot.slane %v1471_v35, 4 }
 0x72c   : > { %v1473_v19 = vadd.f32 %v1472_v61, %v1471_v35  ;;  %v1762_v35 = vsel %vm313_vm1, %v1760_v41, 0.0  ;;  %v430_v61 = vmul.f32 %v2292_v8, %v429_v55 }
 0x72d   : > { %v1764_v30 = vadd.f32 %v1763_v12, %v1762_v35 }
 0x72e   : > { %v1474_v46 = vrot.slane %v1473_v19, 2 }
 0x730   : > { %v1475_v44 = vadd.f32 %v1474_v46, %v1473_v19  ;;  %v382_v19 = vmul.f32 %v381_v3, %v327_v7  ;;  %v804_v46 = vstv %s2980_s27 }
 0x731   : > { %v805_v17 = vmul.f32 0.00390625, %v804_v46 }
 0x732   : > { %v1476_v2 = vrot.slane %v1475_v44, 1  ;;  %v431_v4 = vadd.f32 %v430_v61, %v382_v19 }
 0x734   : > { %v1477_v42 = vadd.f32 %v1476_v2, %v1475_v44  ;;  %v483_v47 = vadd.f32 %v2970_v20, %v431_v4  ;;  %v2293_v44 = vld [vmem:[#allocation3 + $0x8] sm:$0xff] }
 0x736   : > { %v535_v21 = vadd.f32 %v2972_v43, %v483_v47  ;;  %v3274_v47 = vld [vmem:[#allocation3 + $0x18] sm:$0xff] }
 0x738   : > { %v587_v63 = vadd.f32 %v2974_v56, %v535_v21  ;;  %v1158_v56 = vstv %s3094_s15 }
 0x73a   : > { %v1397_v37 = vpop.xlane.xlu2 %1396 }
 0x73b   : > { %v1398_v10 = vrot.slane %v1397_v37, 4 }
 0x73c   : > { %v1718_v24 = vpop.permute.xlu0 %1717 }
 0x73d   : > { %v1399_v28 = vadd.f32 %v1398_v10, %v1397_v37  ;;  %v1722_v39 = vsel %vm313_vm1, %v1718_v24, 0.0  ;;  %v634_v37 = vadd.f32 %v2976_v6, %v587_v63 }
 0x73e   : > { %v1723_v0 = vadd.f32 %v1722_v39, %v1721_v18 }
 0x73f   : > { %v1400_v23 = vrot.slane %v1399_v28, 2  ;;  %v681_v10 = vadd.f32 %v2978_v11, %v634_v37 }
 0x741   : > { %v1401_v26 = vadd.f32 %v1400_v23, %v1399_v28  ;;  %v728_v28 = vadd.f32 %v2982_v16, %v681_v10 }
 0x742   : > { %v1679_v31 = vpop.permute.xlu2 %1678 }
 0x743   : > { %v1684_v22 = vsel %vm313_vm1, %v1679_v31, 0.0  ;;  %v1402_v48 = vrot.slane %v1401_v26, 1  ;;  %v775_v23 = vadd.f32 %v2987_v58, %v728_v28 }
 0x744   : > { %v1686_v33 = vadd.f32 %v1685_v32, %v1684_v22 }
 0x745   : > { %v1403_v50 = vadd.f32 %v1402_v48, %v1401_v26  ;;  %v806_v26 = vmul.f32 %v2293_v44, %v805_v17  ;;  %v1159_v48 = vmul.f32 0.00390625, %v1158_v56 }
 0x746   : > { %1687 = vadd.xlane.f32.xlu2 %v1686_v33 }
 0x747   : > { %2034 = vpush %v1403_v50  ;;  %v807_v31 = vadd.f32 %v806_v26, %v775_v23 }
 0x748   : > { %2036 = vpush %v1440_v38 }
 0x749   : > { %2038 = vpush %v1477_v42  ;;  %v844_v20 = vadd.f32 %v2990_v29, %v807_v31 }
 0x74b   : > { %v881_v43 = vadd.f32 %v2993_v34, %v844_v20  ;;  %v1160_v34 = vmul.f32 %v1159_v48, %v3098_v40 }
 0x74d   : > { %v918_v6 = vadd.f32 %v2996_v45, %v881_v43 }
 0x74e   : > { %1724 = vadd.xlane.f32.xlu2 %v1723_v0 }
 0x74f   : > { %v969_v11 = vadd.f32 %v3039_v53, %v918_v6  ;;  %v1374_v53 = vld [vmem:[#allocation1 + $0x5] ss:$9 sm:$0xff] }
 0x751   : > { %v1019_v58 = vadd.f32 %v3049_v54, %v969_v11 }
 0x752   : > { %v1540_v14 = vpop.xlane.xlu1 %1539 }
 0x753   : > { %v1541_v32 = vrot.slane %v1540_v14, 4  ;;  %v1069_v38 = vadd.f32 %v3063_v52, %v1019_v58 }
 0x755   : > { %v1542_v22 = vadd.f32 %v1541_v32, %v1540_v14  ;;  %v1119_v39 = vadd.f32 %v3101_v60, %v1069_v38 }
 0x756   : > { %1747 = vadd.xlane.f32.xlu2 %v1746_v59 }
 0x757   : > { %v1543_v50 = vrot.slane %v1542_v22, 2  ;;  %v1161_v13 = vadd.f32 %v1160_v34, %v1119_v39 }
 0x759   : > { %v1544_v54 = vadd.f32 %v1543_v50, %v1542_v22  ;;  %v1208_v1 = vadd.f32 %v3186_v9, %v1161_v13 }
 0x75a   : > { %v1789_v38 = vpop.xlane.xlu1 %1788 }
 0x75b   : > { %v1545_v15 = vrot.slane %v1544_v54, 1  ;;  %v1255_v55 = vadd.f32 %v3195_v36, %v1208_v1 }
 0x75d   : > { %v1302_v3 = vadd.f32 %v3223_v62, %v1255_v55  ;;  %v1546_v12 = vadd.f32 %v1545_v15, %v1544_v54 }
 0x75e   : > { %1765 = vadd.xlane.f32.xlu2 %v1764_v30 }
 0x75f   : > { %v1339_v19 = vadd.f32 %v3228_v25, %v1302_v3 }
 0x76f   : > { %v1614_v16 = vpop.xlane.xlu0 %1613 }
 0x770   : > { %v1615_v24 = vrot.slane %v1614_v16, 4 }
 0x772   : > { %v1616_v0 = vadd.f32 %v1615_v24, %v1614_v16 }
 0x774   : > { %v1617_v52 = vrot.slane %v1616_v0, 2 }
 0x776   : > { %v1618_v9 = vadd.f32 %v1617_v52, %v1616_v0 }
 0x778   : > { %s2035_s11 = spop %2034  ;;  %v1619_v63 = vrot.slane %v1618_v9, 1 }
 0x779   : > { %v1405_v2 = vstv %s2035_s11  ;;  %s2037_s13 = spop %2036  ;;  %s1841_s11 = sshll.u32 %s300_s12, 4  ;;  %s1842_s11 = int_to_ptr.vmem [resolvable:$true] %s1841_s11 }
 0x77a   : > { %v1406_v33 = vmul.f32 0.00390625, %v1405_v2  ;;  %v1442_v49 = vstv %s2037_s13  ;;  %s2039_s27 = spop %2038  ;;  %v1620_v25 = vadd.f32 %v1619_v63, %v1618_v9  ;;  %s1843_s13 = sshll.u32 %s1839_s1, 4  ;;  %s1844_s13 = int_to_ptr.hbm [resolvable:$true] %s1843_s13 }
 0x77b   : > { %v1503_v29 = vpop.xlane.xlu2 %1502  ;;  %v1443_v57 = vmul.f32 0.00390625, %v1442_v49  ;;  %v1479_v61 = vstv %s2039_s27  ;;  %v1790_v49 = vrot.slane %v1789_v38, 4  ;;  %s1831_s27 = scalar_lea.sflag [#allocation5], %s2634_s3 }
 0x77c   : > { %v1407_v45 = vmul.f32 %v1406_v33, %v3098_v40  ;;  %v1504_v42 = vrot.slane %v1503_v29, 4  ;;  %v1480_v4 = vmul.f32 0.00390625, %v1479_v61 }
 0x77d   : > { %v1444_v41 = vmul.f32 %v1443_v57, %v3098_v40  ;;  %v1376_v40 = vadd.f32 %v1374_v53, %v1339_v19  ;;  %v1791_v57 = vadd.f32 %v1790_v49, %v1789_v38 }
 0x77e   : > { %1409 = vst [vmem:[#allocation1] sm:$0xff] %v1407_v45  ;;  %v1505_v18 = vadd.f32 %v1504_v42, %v1503_v29  ;;  %v1481_v17 = vmul.f32 %v1480_v4, %v3274_v47  ;;  %v1812_v45 = vpop.xlane.xlu0 %1811 }
 0x77f   : > { %v1813_v39 = vrot.slane %v1812_v45, 4 }
 0x780   : > { %v1506_v27 = vrot.slane %v1505_v18, 2 }
 0x782   : > { %v1507_v51 = vadd.f32 %v1506_v27, %v1505_v18  ;;  %v1814_v27 = vadd.f32 %v1813_v39, %v1812_v45 }
 0x783   : > { %v1577_v59 = vpop.xlane.xlu2 %1576 }
 0x784   : > { %v1578_v5 = vrot.slane %v1577_v59, 4  ;;  %v1508_v60 = vrot.slane %v1507_v51, 1  ;;  %v1815_v55 = vrot.slane %v1814_v27, 2 }
 0x785   : > { %v1411_v7 = vld [vmem:[#allocation1 + $0x6] ss:$9 sm:$0xff] }
 0x786   : > { %1446 = vst [vmem:[#allocation1] sm:$0xff] %v1444_v41  ;;  %v1579_v35 = vadd.f32 %v1578_v5, %v1577_v59  ;;  %v1509_v8 = vadd.f32 %v1508_v60, %v1507_v51  ;;  %v1413_v37 = vadd.f32 %v1411_v7, %v1376_v40  ;;  %v1792_v59 = vrot.slane %v1791_v57, 2 }
 0x787   : > { %v1816_v61 = vadd.f32 %v1815_v55, %v1814_v27 }
 0x788   : > { %v1580_v30 = vrot.slane %v1579_v35, 2  ;;  %2040 = vpush %v1509_v8 }
 0x789   : > { %2042 = vpush %v1546_v12 }
 0x78a   : > { %v1581_v36 = vadd.f32 %v1580_v30, %v1579_v35  ;;  %v1793_v35 = vadd.f32 %v1792_v59, %v1791_v57 }
 0x78b   : > { %v1651_v21 = vpop.xlane.xlu2 %1650 }
 0x78c   : > { %v1652_v62 = vrot.slane %v1651_v21, 4  ;;  %v1582_v46 = vrot.slane %v1581_v36, 1  ;;  %v1794_v40 = vrot.slane %v1793_v35, 1 }
 0x78d   : > { %v1448_v10 = vld [vmem:[#allocation1 + $0x7] ss:$9 sm:$0xff] }
 0x78e   : > { %v1450_v28 = vadd.f32 %v1448_v10, %v1413_v37  ;;  %v1653_v23 = vadd.f32 %v1652_v62, %v1651_v21  ;;  %v1583_v44 = vadd.f32 %v1582_v46, %v1581_v36  ;;  %v1817_v36 = vrot.slane %v1816_v61, 1 }
 0x78f   : > { %v1795_v37 = vadd.f32 %v1794_v40, %v1793_v35 }
 0x790   : > { %v3277_v26 = vadd.f32 %v1481_v17, %v1450_v28  ;;  %v1654_v31 = vrot.slane %v1653_v23, 2  ;;  %2044 = vpush %v1583_v44  ;;  %v1818_v62 = vadd.f32 %v1817_v36, %v1816_v61 }
 0x791   : > { %2046 = vpush %v1620_v25 }
 0x792   : > { %v1655_v14 = vadd.f32 %v1654_v31, %v1653_v23 }
 0x794   : > { %v1656_v20 = vrot.slane %v1655_v14, 1 }
 0x796   : > { %v1657_v32 = vadd.f32 %v1656_v20, %v1655_v14 }
 0x798   : > { %2048 = vpush %v1657_v32 }
 0x7b9   : > { %s2041_s28 = spop %2040  ;;  %v1688_v43 = vpop.xlane.xlu2 %1687 }
 0x7ba   : > { %v1511_v56 = vstv %s2041_s28  ;;  %v1689_v6 = vrot.slane %v1688_v43, 4  ;;  %s2043_s14 = spop %2042  ;;  %s2398_s28 = sshra.s32 %s1844_s13, 4  ;;  %s2399_s28 = int_to_ptr.hbm [resolvable:$true] %s2398_s28 }
 0x7bb   : > { %v1512_v22 = vmul.f32 0.00390625, %v1511_v56  ;;  %v1548_v1 = vstv %s2043_s14  ;;  %s2400_s14 = scalar_lea.hbm %s2399_s28, 1  ;;  %p2405_p4 = scmp.lt.s32.totalorder %s2399_s28, %s3326_s5 }
 0x7bc   : > { %v1690_v11 = vadd.f32 %v1689_v6, %v1688_v43  ;;  %v1549_v15 = vmul.f32 0.00390625, %v1548_v1  ;;  %p2401_p3 = scmp.ne.s32.totalorder %s2399_s28, %s2400_s14 }
 0x7bd   : > { %v1513_v48 = vmul.f32 %v1512_v22, %v3274_v47 }
 0x7be   : > { %v1691_v16 = vrot.slane %v1690_v11, 2  ;;  %v1550_v8 = vmul.f32 %v1549_v15, %v3274_v47  ;;  %p2402_p6 = pnand %p2401_p3, %p2586_p11 }
 0x7bf   : > { %1515 = vst [vmem:[#allocation1] sm:$0xff] %v1513_v48 }
 0x7c0   : > { %v1692_v2 = vadd.f32 %v1691_v16, %v1690_v11  ;;  %p2403_p8 = pneg %p2402_p6 }
 0x7c1   : > { %v1725_v58 = vpop.xlane.xlu2 %1724  ;;  %s2045_s30 = spop %2044 }
 0x7c2   : > { %v1726_v33 = vrot.slane %v1725_v58, 4  ;;  %v1693_v50 = vrot.slane %v1692_v2, 1  ;;  %v1585_v19 = vstv %s2045_s30  ;;  %s2047_s16 = spop %2046 }
 0x7c3   : > { %v1586_v21 = vmul.f32 0.00390625, %v1585_v19  ;;  %v1622_v28 = vstv %s2047_s16  ;;  %s2404_s16 = scalar_lea.hbm %s3326_s5, 2 }
 0x7c4   : > { %v1727_v24 = vadd.f32 %v1726_v33, %v1725_v58  ;;  %v1694_v29 = vadd.f32 %v1693_v50, %v1692_v2  ;;  %v1623_v17 = vmul.f32 0.00390625, %v1622_v28  ;;  %v380_v33 = vld [vmem:[#allocation3 + $0x20] sm:$0xf]  ;;  %p2406_p10 = scmp.lt.s32.totalorder %s2404_s16, %s2400_s14 }
 0x7c5   : > { %v1587_v10 = vmul.f32 %v1586_v21, %v3274_v47 }
 0x7c6   : > { %v1728_v34 = vrot.slane %v1727_v24, 2  ;;  %2050 = vpush %v1694_v29  ;;  %v1517_v9 = vld [vmem:[#allocation1 + $0x1] ss:$9 sm:$0xff]  ;;  %v1624_v23 = vmul.f32 %v1623_v17, %v3274_v47  ;;  %p2407_p1 = por %p2406_p10, %p2405_p4 }
 0x7c7   : > { %1552 = vst [vmem:[#allocation1] sm:$0xff] %v1550_v8  ;;  %v1519_v38 = vadd.f32 %v1517_v9, %v3277_v26 }
 0x7c8   : > { %v1729_v42 = vadd.f32 %v1728_v34, %v1727_v24  ;;  %p2408_p5 = pnand %p2407_p1, %p2403_p8 }
 0x7c9   : > { %v1748_v53 = vpop.xlane.xlu2 %1747  ;;  %s2049_s17 = spop %2048 }
 0x7ca   : > { %v1749_v18 = vrot.slane %v1748_v53, 4  ;;  %v1730_v0 = vrot.slane %v1729_v42, 1  ;;  %v1659_v44 = vstv %s2049_s17 }
 0x7cb   : > { %v1660_v31 = vmul.f32 0.00390625, %v1659_v44 }
 0x7cc   : > { %v1750_v54 = vadd.f32 %v1749_v18, %v1748_v53  ;;  %v1731_v13 = vadd.f32 %v1730_v0, %v1729_v42 }
 0x7cd   : > { %v1661_v14 = vmul.f32 %v1660_v31, %v3274_v47 }
 0x7ce   : > { %v1751_v51 = vrot.slane %v1750_v54, 2  ;;  %2052 = vpush %v1731_v13  ;;  %v1554_v46 = vld [vmem:[#allocation1 + $0x2] ss:$9 sm:$0xff] }
 0x7cf   : > { %1589 = vst [vmem:[#allocation1] sm:$0xff] %v1587_v10  ;;  %v1556_v45 = vadd.f32 %v1554_v46, %v1519_v38 }
 0x7d0   : > { %v1752_v52 = vadd.f32 %v1751_v51, %v1750_v54 }
 0x7d1   : > { %v1766_v41 = vpop.xlane.xlu2 %1765 }
 0x7d2   : > { %v1767_v5 = vrot.slane %v1766_v41, 4  ;;  %v1753_v60 = vrot.slane %v1752_v52, 1 }
 0x7d4   : > { %v1768_v7 = vadd.f32 %v1767_v5, %v1766_v41  ;;  %v1754_v3 = vadd.f32 %v1753_v60, %v1752_v52 }
 0x7d6   : > { %v1769_v12 = vrot.slane %v1768_v7, 2  ;;  %2054 = vpush %v1754_v3  ;;  %v1591_v25 = vld [vmem:[#allocation1 + $0x3] ss:$9 sm:$0xff] }
 0x7d7   : > { %1626 = vst [vmem:[#allocation1] sm:$0xff] %v1624_v23  ;;  %v1593_v42 = vadd.f32 %v1591_v25, %v1556_v45 }
 0x7d8   : > { %v1770_v30 = vadd.f32 %v1769_v12, %v1768_v7 }
 0x7da   : > { %v1771_v4 = vrot.slane %v1770_v30, 1 }
 0x7dc   : > { %v1772_v63 = vadd.f32 %v1771_v4, %v1770_v30 }
 0x7de   : > { %2056 = vpush %v1772_v63  ;;  %v1628_v20 = vld [vmem:[#allocation1 + $0x4] ss:$9 sm:$0xff] }
 0x7df   : > { %2058 = vpush %v1795_v37  ;;  %v1630_v39 = vadd.f32 %v1628_v20, %v1593_v42 }
 0x7e0   : > { %2060 = vpush %v1818_v62 }
 0x7e1   : > { %1663 = vst [vmem:[#allocation1] sm:$0xff] %v1661_v14 }
 0x7e8   : > { %v1665_v6 = vld [vmem:[#allocation1 + $0x5] ss:$9 sm:$0xff] }
 0x7e9   : > { %v1667_v0 = vadd.f32 %v1665_v6, %v1630_v39 }
 0x7f7   : > { %s2051_s24 = spop %2050 }
 0x7f8   : > { %v1696_v32 = vstv %s2051_s24 }
 0x7f9   : > { %v1697_v43 = vmul.f32 0.00390625, %v1696_v32 }
 0x7fb   : > { %v1698_v56 = vmul.f32 %v1697_v43, %v3274_v47 }
 0x7fd   : > { %1700 = vst [vmem:[#allocation1] sm:$0xff] %v1698_v56 }
 0x7ff   : > { %s2053_s19 = spop %2052 }
 0x800   : > { %v1733_v22 = vstv %s2053_s19 }
 0x801   : > { %v1734_v11 = vmul.f32 0.00390625, %v1733_v22 }
 0x803   : > { %v1735_v48 = vmul.f32 %v1734_v11, %v3274_v47 }
 0x804   : > { %v1702_v16 = vld [vmem:[#allocation1 + $0x6] ss:$9 sm:$0xff] }
 0x805   : > { %1737 = vst [vmem:[#allocation1] sm:$0xff] %v1735_v48  ;;  %v1704_v13 = vadd.f32 %v1702_v16, %v1667_v0 }
 0x807   : > { %s2055_s15 = spop %2054 }
 0x808   : > { %v1756_v18 = vstv %s2055_s15 }
 0x809   : > { %v1757_v57 = vmul.f32 0.00390625, %v1756_v18 }
 0x80b   : > { %v1758_v51 = vmul.f32 %v1757_v57, %v380_v33 }
 0x80c   : > { %v1739_v24 = vld [vmem:[#allocation1 + $0x7] ss:$9 sm:$0xff] }
 0x80d   : > { %v1741_v27 = vadd.f32 %v1739_v24, %v1704_v13 }
 0x80f   : > { %s2057_s18 = spop %2056  ;;  %v1759_v52 = vadd.f32 %v1758_v51, %v1741_v27 }
 0x810   : > { %v1774_v2 = vstv %s2057_s18  ;;  %s2059_s8 = spop %2058 }
 0x811   : > { %v1775_v58 = vmul.f32 0.00390625, %v1774_v2  ;;  %v1797_v29 = vstv %s2059_s8  ;;  %s2061_s25 = spop %2060 }
 0x812   : > { %v1798_v34 = vmul.f32 0.00390625, %v1797_v29  ;;  %v1820_v47 = vstv %s2061_s25 }
 0x813   : > { %v1776_v50 = vmul.f32 %v1775_v58, %v380_v33  ;;  %v1821_v54 = vmul.f32 0.00390625, %v1820_v47 }
 0x814   : > { %v1799_v49 = vmul.f32 %v1798_v34, %v380_v33 }
 0x815   : > { %1778 = vst [vmem:[#allocation1] sm:$0xff] %v1776_v50  ;;  %v1822_v1 = vmul.f32 %v1821_v54, %v380_v33 }
 0x81c   : > { %v1780_v53 = vld [vmem:[#allocation1 + $0x1] ss:$9 sm:$0xff] }
 0x81d   : > { %1801 = vst [vmem:[#allocation1] sm:$0xff] %v1799_v49  ;;  %v1782_v59 = vadd.f32 %v1780_v53, %v1759_v52 }
 0x824   : > { %v1803_v26 = vld [vmem:[#allocation1 + $0x2] ss:$9 sm:$0xff] }
 0x825   : > { %1824 = vst [vmem:[#allocation1] sm:$0xff] %v1822_v1  ;;  %v1805_v15 = vadd.f32 %v1803_v26, %v1782_v59 }
 0x82c   : > { %v1826_v41 = vld [vmem:[#allocation1 + $0x3] ss:$9 sm:$0xff] }
 0x82d   : > { %v1828_v55 = vadd.f32 %v1826_v41, %v1805_v15 }
 0x82f   : > { %1829 = vst [vmem:[%s300_s12] sm:$0x1] %v1828_v55 }
 0x830   : > { %2411 = shalt.err (!%p2408_p5)
}
 0x831   : > { %2070 = dma.vmem_to_hbm [thread:$0]  (%p2586_p11), %s1842_s11, 16, %s1844_s13, %s1831_s27  }
 0x832 PF: > { %s1855_s3 = sand.u32 1, %s2442_s20   ;;  %p3340_p7 = scmp.ge.s32.totalorder %s2454_s23, 2 }
 0x833   : > { %s1856_s19 = scalar_lea.sflag [#allocation5], %s1855_s3 }
 0x834   : > { %p2084_p9 = pnand %p3340_p7, %p2590_p12 }
 0x836   : > { %p2085_p13 = pneg %p2084_p9 }
 0x838   : > { %2437 = dma.done.wait (%p2085_p13), %s1856_s19, 16  }
 0x839   : > { %2439 = vsyncadd (%p2085_p13), %s1856_s19, 4294967280  ;;  %p20_p0 = scmp.ge.s32.totalorder %s2519_s0, 4   ;;  %s3341_s20 = smov %s2446_s21 }
 0x83a   : > { %s3342_s21 = smov %s2450_s22  ;;  %s3343_s22 = smov %s2530_s26 }
 0x83b   : > { %s3344_s23 = smov %s2519_s0  ;;  %22 = sbr.rel (!%p20_p0) target bundleno = 10 (0xa), region = 135 }
 0x840   :  { %1861 = vsyncpa [#allocation4], 1 }
 0x841   :  { %1863 = vsyncpa [#allocation4 + $0x1], 1 }
 0x842   :  { %1864 = vsyncpa [#allocation7], 1 }
 0x843   :  { %1866 = vsyncpa [#allocation7 + $0x1], 1 }
 0x844   :  { %1867 = vsyncpa [#allocation5], 1 }
 0x845   :  { %1869 = vsyncpa [#allocation5 + $0x1], 1 }

</bundles_post_ra>
